<compile_context>
chip_gen: v7x
topology: tpu7x:2x2x1
jax: 0.10.0
libtpu: 0.0.40
codegen_flags: <defaults>
</compile_context>

<pallas_src>
import functools

import jax
import jax.numpy as jnp
from jax.experimental import pallas as pl
from jax.experimental.pallas import tpu as pltpu


# --------------------------------------------------------------------------------------
# Kernel: one grid step == NB images, activations laid out as (channels, NB*H*W)
# --------------------------------------------------------------------------------------
def _mbconv_kernel(x_ref, mask_ref, we_ref, be_ref, wd_ref, bd_ref,
                   w1_ref, b1_ref, w2_ref, b2_ref, wp_ref, bp_ref, o_ref,
                   *, shifts, hw, nb, use_residual):
    f32 = jnp.float32
    bf16 = jnp.bfloat16
    x = x_ref[...].astype(f32)                       # (C_in, L), L = NB*HW
    lanes = x.shape[-1]

    # ---- expand conv 3x3 (+BN folded) + SiLU: ONE MXU matmul with K = 9*C_in ----------
    taps = []
    for k, d in enumerate(shifts):
        if d == 0:
            xs = x
        else:
            xs = pltpu.roll(x, shift=(-d) % lanes, axis=1) * mask_ref[k:k + 1, :]
        taps.append(xs)
    x_taps = jnp.concatenate(taps, axis=0).astype(bf16)          # (9*C_in, L)
    acc = jnp.dot(we_ref[...], x_taps, preferred_element_type=f32) + be_ref[...]
    h1 = acc * jax.nn.sigmoid(acc)                               # SiLU, (hidden, L) f32

    # ---- depthwise conv 3x3 (+BN folded) + SiLU: XLU roll + VPU scale-accumulate ------
    acc2 = jnp.zeros_like(h1)
    for k, d in enumerate(shifts):
        if d == 0:
            hs = h1
        else:
            hs = pltpu.roll(h1, shift=(-d) % lanes, axis=1) * mask_ref[k:k + 1, :]
        acc2 = acc2 + wd_ref[k] * hs                             # (hidden,1)*(hidden,L)
    acc2 = acc2 + bd_ref[...]
    h2 = acc2 * jax.nn.sigmoid(acc2)                             # (hidden, L) f32

    # ---- squeeze-excitation per image segment (tiny: VPU broadcast + XLU reductions) --
    segs = []
    for n in range(nb):
        seg = h2[:, n * hw:(n + 1) * hw]                                       # (hidden, HW)
        pooled = jnp.sum(seg, axis=1, keepdims=True) * (1.0 / hw)              # (hidden, 1)
        z = jnp.sum(w1_ref[...] * pooled, axis=0, keepdims=True) + b1_ref[...]  # (1, R)
        z = z * jax.nn.sigmoid(z)                                               # SiLU
        s = jnp.sum(w2_ref[...] * z, axis=1, keepdims=True) + b2_ref[...]       # (hidden, 1)
        segs.append(seg * jax.nn.sigmoid(s))
    h3 = segs[0] if nb == 1 else jnp.concatenate(segs, axis=1)                  # (hidden, L)

    # ---- project 1x1 conv + BN (folded), optional residual ----------------------------
    out = jnp.dot(wp_ref[...], h3.astype(bf16), preferred_element_type=f32) + bp_ref[...]
    if use_residual:
        out = out + x
    o_ref[...] = out.astype(o_ref.dtype)


# --------------------------------------------------------------------------------------
# Wrapper helpers
# --------------------------------------------------------------------------------------
def _tap_shifts(H, W):
    """Flat-index offsets for the 3x3 taps, (dy, dx) row-major (same order as weights)."""
    return tuple(dy * W + dx for dy in (-1, 0, 1) for dx in (-1, 0, 1))


def _tap_masks(H, W, nb, dtype=jnp.float32):
    """(9, nb*H*W) validity masks for zero-padded 3x3 taps, tiled over the nb images."""
    ys, xs = jnp.meshgrid(jnp.arange(H), jnp.arange(W), indexing="ij")
    rows = []
    for dy in (-1, 0, 1):
        for dx in (-1, 0, 1):
            valid = ((ys + dy >= 0) & (ys + dy < H) &
                     (xs + dx >= 0) & (xs + dx < W)).reshape(-1)
            rows.append(valid.astype(dtype))
    return jnp.tile(jnp.stack(rows, axis=0), (1, nb))            # (9, nb*HW)


def _num_lane_blocks(N, HW, num_blocks):
    """Grid steps along the batch/lane axis.

    Default: 2 steps when the batch splits cleanly (keeps both v7x TensorCores busy; the
    extra ~0.35us per-step cost is negligible on single-TC v5e/v6e).  Pass num_blocks=1
    on v5e/v6e for the single largest block.
    """
    g = num_blocks if num_blocks is not None else (2 if (N % 2 == 0 and N >= 2) else 1)
    if g > 1 and (N % g != 0 or ((N // g) * HW) % 128 != 0):
        g = 1   # fall back to one full-extent block (always a legal BlockSpec)
    return g


def inverted_residual_block(x, we, be, bn_e, wd, bd, bn_d,
                            w1, b1, w2, b2, wp, bn_p,
                            *, kernel_size=3, stride=1, padding=1, eps=1e-5,
                            num_blocks=None):
    """Eval-mode forward of InvertedResidualBlock (expand_ratio != 1 path).

    x:  (N, C_in, H, W)
    we: (hidden, C_in, 3, 3), be: (hidden,), bn_e: (gamma, beta, mean, var)   expand ConvBlock
    wd: (hidden, 1, 3, 3),    bd: (hidden,), bn_d: (gamma, beta, mean, var)   depthwise ConvBlock
    w1: (R, hidden), b1: (R,), w2: (hidden, R), b2: (hidden,)                 SqueezeExcitation
    wp: (C_out, hidden), bn_p: (gamma, beta, mean, var)                       project conv + BN
    """
    N, C_in, H, W = x.shape
    hidden = we.shape[0]
    C_out = wp.shape[0]
    R = w1.shape[0]
    HW = H * W
    assert kernel_size == 3 and stride == 1 and padding == 1, \
        "only kernel_size=3, stride=1, padding=1 implemented"
    use_residual = (C_in == C_out) and (stride == 1)

    # ---- fold BatchNorm (eval / running stats) into conv weights & biases -------------
    def fold(w, b, bn):
        g, beta, mu, var = bn
        s = g / jnp.sqrt(var + eps)
        w_f = w * s.reshape((-1,) + (1,) * (w.ndim - 1))
        b0 = b if b is not None else jnp.zeros_like(mu)
        return w_f, (b0 - mu) * s + beta

    we_f, be_f = fold(we, be, bn_e)          # (hidden, C_in, 3, 3), (hidden,)
    wd_f, bd_f = fold(wd, bd, bn_d)          # (hidden, 1, 3, 3),    (hidden,)
    wp_f, bp_f = fold(wp, None, bn_p)        # (C_out, hidden),      (C_out,)

    # ---- pack weights once (dense, lane-layout friendly, bf16 for the MXU) ------------
    f32, bf16 = jnp.float32, jnp.bfloat16
    we_p = jnp.transpose(we_f, (0, 2, 3, 1)).reshape(hidden, 9 * C_in).astype(bf16)
    be_c = be_f.reshape(hidden, 1).astype(f32)
    wd_p = jnp.transpose(wd_f.reshape(hidden, 9), (1, 0)).reshape(9, hidden, 1).astype(f32)
    bd_c = bd_f.reshape(hidden, 1).astype(f32)
    w1t = w1.T.astype(f32)                                  # (hidden, R)
    b1r = b1.reshape(1, R).astype(f32)
    w2m = w2.astype(f32)                                    # (hidden, R)
    b2c = b2.reshape(hidden, 1).astype(f32)
    wp_p = wp_f.astype(bf16)                                # (C_out, hidden)
    bp_c = bp_f.reshape(C_out, 1).astype(f32)

    # ---- lane layout: batch*spatial on lanes, channels on sublanes --------------------
    G = _num_lane_blocks(N, HW, num_blocks)
    NB = N // G
    NBHW = NB * HW
    x_lanes = jnp.transpose(x, (1, 0, 2, 3)).reshape(C_in, N * HW)
    masks = _tap_masks(H, W, NB, dtype=f32)                 # (9, NBHW)
    shifts = _tap_shifts(H, W)

    kernel = functools.partial(_mbconv_kernel, shifts=shifts, hw=HW, nb=NB,
                               use_residual=use_residual)

    out_lanes = pl.pallas_call(
        kernel,
        out_shape=jax.ShapeDtypeStruct((C_out, N * HW), x.dtype),
        grid_spec=pltpu.PrefetchScalarGridSpec(
            num_scalar_prefetch=0,
            grid=(G,),
            in_specs=[
                pl.BlockSpec((C_in, NBHW), lambda i: (0, i)),        # x (batch slice on lanes)
                pl.BlockSpec((9, NBHW), lambda i: (0, 0)),           # tap boundary masks
                pl.BlockSpec((hidden, 9 * C_in), lambda i: (0, 0)),  # expand w (bf16, K=9*C_in)
                pl.BlockSpec((hidden, 1), lambda i: (0, 0)),         # expand b
                pl.BlockSpec((9, hidden, 1), lambda i: (0, 0, 0)),   # depthwise w per tap
                pl.BlockSpec((hidden, 1), lambda i: (0, 0)),         # depthwise b
                pl.BlockSpec((hidden, R), lambda i: (0, 0)),         # SE w1 (pre-transposed)
                pl.BlockSpec((1, R), lambda i: (0, 0)),              # SE b1
                pl.BlockSpec((hidden, R), lambda i: (0, 0)),         # SE w2
                pl.BlockSpec((hidden, 1), lambda i: (0, 0)),         # SE b2
                pl.BlockSpec((C_out, hidden), lambda i: (0, 0)),     # project w (bf16)
                pl.BlockSpec((C_out, 1), lambda i: (0, 0)),          # project b
            ],
            out_specs=pl.BlockSpec((C_out, NBHW), lambda i: (0, i)),
        ),
        compiler_params=pltpu.CompilerParams(
            dimension_semantics=("parallel",),
            vmem_limit_bytes=32 * 1024 * 1024,
        ),
    )(x_lanes, masks, we_p, be_c, wd_p, bd_c, w1t, b1r, w2m, b2c, wp_p, bp_c)

    return jnp.transpose(out_lanes.reshape(C_out, N, H, W), (1, 0, 2, 3))


# --------------------------------------------------------------------------------------
# Pure-JAX reference (mirrors the PyTorch module in eval mode)
# --------------------------------------------------------------------------------------
def _reference_forward(x, we, be, bn_e, wd, bd, bn_d, w1, b1, w2, b2, wp, bn_p,
                       *, stride=1, padding=1, eps=1e-5):
    hp = jax.lax.Precision.HIGHEST

    def conv(z, w, b, s, p, groups=1):
        o = jax.lax.conv_general_dilated(
            z, w, (s, s), [(p, p), (p, p)],
            dimension_numbers=("NCHW", "OIHW", "NCHW"),
            feature_group_count=groups, precision=hp)
        return o if b is None else o + b[None, :, None, None]

    def bn(z, params):
        g, beta, mu, var = params
        return (g[None, :, None, None] * (z - mu[None, :, None, None])
                / jnp.sqrt(var[None, :, None, None] + eps) + beta[None, :, None, None])

    def silu(z):
        return z * jax.nn.sigmoid(z)

    h = silu(bn(conv(x, we, be, 1, 1), bn_e))
    h = silu(bn(conv(h, wd, bd, stride, padding, groups=wd.shape[0]), bn_d))
    pooled = jnp.mean(h, axis=(2, 3))                                   # (N, hidden)
    z = jnp.dot(pooled, w1.T, precision=hp) + b1
    z = silu(z)
    s = jax.nn.sigmoid(jnp.dot(z, w2.T, precision=hp) + b2)
    h = h * s[:, :, None, None]
    out = bn(jnp.einsum("oc,nchw->nohw", wp, h, precision=hp), bn_p)
    if x.shape[1] == wp.shape[0] and stride == 1:
        out = out + x                                                   # eval: no stochastic depth
    return out


# --------------------------------------------------------------------------------------
# Demo / self-test
# --------------------------------------------------------------------------------------
if __name__ == "__main__":
    N, C_in, H, W = 4, 8, 16, 16
    expand_ratio, reduction = 2, 4
    C_out, kernel_size, stride, padding = 8, 3, 1, 1
    hidden = C_in * expand_ratio            # 16
    R = max(1, C_in // reduction)           # 2

    key = jax.random.PRNGKey(0)
    k = list(jax.random.split(key, 24))

    def nrm(kk, shape, scale=1.0):
        return scale * jax.random.normal(kk, shape, dtype=jnp.float32)

    def uni(kk, shape):
        return jax.random.uniform(kk, shape, dtype=jnp.float32, minval=0.5, maxval=1.5)

    x = nrm(k[0], (N, C_in, H, W))

    # expand ConvBlock: Conv2d(C_in, hidden, 3, 1, 1) (+bias) + BN + SiLU
    we = nrm(k[1], (hidden, C_in, 3, 3), 0.2)
    be = nrm(k[2], (hidden,), 0.1)
    bn_e = (uni(k[3], (hidden,)), nrm(k[4], (hidden,), 0.1),
            nrm(k[5], (hidden,), 0.1), uni(k[6], (hidden,)))

    # depthwise ConvBlock: Conv2d(hidden, hidden, 3, 1, 1, groups=hidden) (+bias) + BN + SiLU
    wd = nrm(k[7], (hidden, 1, 3, 3), 0.2)
    bd = nrm(k[8], (hidden,), 0.1)
    bn_d = (uni(k[9], (hidden,)), nrm(k[10], (hidden,), 0.1),
            nrm(k[11], (hidden,), 0.1), uni(k[12], (hidden,)))

    # SqueezeExcitation: Conv2d(hidden, R, 1) -> SiLU -> Conv2d(R, hidden, 1) -> Sigmoid
    w1 = nrm(k[13], (R, hidden), 0.2)
    b1 = nrm(k[14], (R,), 0.1)
    w2 = nrm(k[15], (hidden, R), 0.2)
    b2 = nrm(k[16], (hidden,), 0.1)

    # project: Conv2d(hidden, C_out, 1, bias=False) + BN
    wp = nrm(k[17], (C_out, hidden), 0.2)
    bn_p = (uni(k[18], (C_out,)), nrm(k[19], (C_out,), 0.1),
            nrm(k[20], (C_out,), 0.1), uni(k[21], (C_out,)))

    fwd = jax.jit(functools.partial(inverted_residual_block,
                                    kernel_size=kernel_size, stride=stride, padding=padding))
    out = jax.block_until_ready(fwd(x, we, be, bn_e, wd, bd, bn_d,
                                    w1, b1, w2, b2, wp, bn_p))

    ref = _reference_forward(x, we, be, bn_e, wd, bd, bn_d,
                             w1, b1, w2, b2, wp, bn_p,
                             stride=stride, padding=padding)
    err = float(jnp.max(jnp.abs(out - ref)))
    assert out.shape == (N, C_out, H, W)
    # Tolerance reflects bf16 MXU operands (f32 accumulate) vs the f32 reference.
    assert jnp.allclose(out, ref, atol=1e-1, rtol=5e-2), f"mismatch vs reference, max|err|={err}"
    print("KERNEL_OK")
</pallas_src>

<mosaic_0001>
module attributes {stable_mosaic.version = 11 : i64} {
  func.func @_mbconv_kernel(%arg0: i32, %arg1: memref<8x512xf32, #tpu.memory_space<vmem>>, %arg2: memref<9x512xf32, #tpu.memory_space<vmem>>, %arg3: memref<16x72xbf16, #tpu.memory_space<vmem>>, %arg4: memref<16x1xf32, #tpu.memory_space<vmem>>, %arg5: memref<9x16x1xf32, #tpu.memory_space<vmem>>, %arg6: memref<16x1xf32, #tpu.memory_space<vmem>>, %arg7: memref<16x2xf32, #tpu.memory_space<vmem>>, %arg8: memref<1x2xf32, #tpu.memory_space<vmem>>, %arg9: memref<16x2xf32, #tpu.memory_space<vmem>>, %arg10: memref<16x1xf32, #tpu.memory_space<vmem>>, %arg11: memref<8x16xbf16, #tpu.memory_space<vmem>>, %arg12: memref<8x1xf32, #tpu.memory_space<vmem>>, %arg13: memref<8x512xf32, #tpu.memory_space<vmem>>) attributes {dimension_semantics = [#tpu.dimension_semantics<parallel>], iteration_bounds = array<i64: 2>, scalar_prefetch = 0 : i64, scratch_operands = 0 : i64, tpu.core_type = #tpu.core_type<tc>, window_params = [{transform_indices = @transform_0, window_bounds = array<i64: 8, 512>}, {pipeline_mode = #tpu.pipeline_mode<synchronous>, transform_indices = @transform_1, window_bounds = array<i64: 9, 512>}, {pipeline_mode = #tpu.pipeline_mode<synchronous>, transform_indices = @transform_2, window_bounds = array<i64: 16, 72>}, {pipeline_mode = #tpu.pipeline_mode<synchronous>, transform_indices = @transform_3, window_bounds = array<i64: 16, 1>}, {pipeline_mode = #tpu.pipeline_mode<synchronous>, transform_indices = @transform_4, window_bounds = array<i64: 9, 16, 1>}, {pipeline_mode = #tpu.pipeline_mode<synchronous>, transform_indices = @transform_5, window_bounds = array<i64: 16, 1>}, {pipeline_mode = #tpu.pipeline_mode<synchronous>, transform_indices = @transform_6, window_bounds = array<i64: 16, 2>}, {pipeline_mode = #tpu.pipeline_mode<synchronous>, transform_indices = @transform_7, window_bounds = array<i64: 1, 2>}, {pipeline_mode = #tpu.pipeline_mode<synchronous>, transform_indices = @transform_8, window_bounds = array<i64: 16, 2>}, {pipeline_mode = #tpu.pipeline_mode<synchronous>, transform_indices = @transform_9, window_bounds = array<i64: 16, 1>}, {pipeline_mode = #tpu.pipeline_mode<synchronous>, transform_indices = @transform_10, window_bounds = array<i64: 8, 16>}, {pipeline_mode = #tpu.pipeline_mode<synchronous>, transform_indices = @transform_11, window_bounds = array<i64: 8, 1>}, {transform_indices = @transform_12, window_bounds = array<i64: 8, 512>}]} {
    %c0 = arith.constant 0 : index
    %c0_0 = arith.constant 0 : index
    %0 = vector.load %arg1[%c0, %c0_0] : memref<8x512xf32, #tpu.memory_space<vmem>>, vector<8x512xf32>
    %c17_i32 = arith.constant 17 : i32
    %1 = tpu.dynamic_rotate %0 by %c17_i32 dim 1 : vector<8x512xf32>, i32 -> vector<8x512xf32>
    %c0_1 = arith.constant 0 : index
    %c0_2 = arith.constant 0 : index
    %2 = vector.load %arg2[%c0_1, %c0_2] : memref<9x512xf32, #tpu.memory_space<vmem>>, vector<1x512xf32>
    %3 = vector.broadcast %2 : vector<1x512xf32> to vector<8x512xf32>
    %4 = arith.mulf %1, %3 : vector<8x512xf32>
    %c16_i32 = arith.constant 16 : i32
    %5 = tpu.dynamic_rotate %0 by %c16_i32 dim 1 : vector<8x512xf32>, i32 -> vector<8x512xf32>
    %c1 = arith.constant 1 : index
    %c0_3 = arith.constant 0 : index
    %6 = vector.load %arg2[%c1, %c0_3] : memref<9x512xf32, #tpu.memory_space<vmem>>, vector<1x512xf32>
    %7 = vector.broadcast %6 : vector<1x512xf32> to vector<8x512xf32>
    %8 = arith.mulf %5, %7 : vector<8x512xf32>
    %c15_i32 = arith.constant 15 : i32
    %9 = tpu.dynamic_rotate %0 by %c15_i32 dim 1 : vector<8x512xf32>, i32 -> vector<8x512xf32>
    %c2 = arith.constant 2 : index
    %c0_4 = arith.constant 0 : index
    %10 = vector.load %arg2[%c2, %c0_4] : memref<9x512xf32, #tpu.memory_space<vmem>>, vector<1x512xf32>
    %11 = vector.broadcast %10 : vector<1x512xf32> to vector<8x512xf32>
    %12 = arith.mulf %9, %11 : vector<8x512xf32>
    %c1_i32 = arith.constant 1 : i32
    %13 = tpu.dynamic_rotate %0 by %c1_i32 dim 1 : vector<8x512xf32>, i32 -> vector<8x512xf32>
    %c3 = arith.constant 3 : index
    %c0_5 = arith.constant 0 : index
    %14 = vector.load %arg2[%c3, %c0_5] : memref<9x512xf32, #tpu.memory_space<vmem>>, vector<1x512xf32>
    %15 = vector.broadcast %14 : vector<1x512xf32> to vector<8x512xf32>
    %16 = arith.mulf %13, %15 : vector<8x512xf32>
    %c511_i32 = arith.constant 511 : i32
    %17 = tpu.dynamic_rotate %0 by %c511_i32 dim 1 : vector<8x512xf32>, i32 -> vector<8x512xf32>
    %c5 = arith.constant 5 : index
    %c0_6 = arith.constant 0 : index
    %18 = vector.load %arg2[%c5, %c0_6] : memref<9x512xf32, #tpu.memory_space<vmem>>, vector<1x512xf32>
    %19 = vector.broadcast %18 : vector<1x512xf32> to vector<8x512xf32>
    %20 = arith.mulf %17, %19 : vector<8x512xf32>
    %c497_i32 = arith.constant 497 : i32
    %21 = tpu.dynamic_rotate %0 by %c497_i32 dim 1 : vector<8x512xf32>, i32 -> vector<8x512xf32>
    %c6 = arith.constant 6 : index
    %c0_7 = arith.constant 0 : index
    %22 = vector.load %arg2[%c6, %c0_7] : memref<9x512xf32, #tpu.memory_space<vmem>>, vector<1x512xf32>
    %23 = vector.broadcast %22 : vector<1x512xf32> to vector<8x512xf32>
    %24 = arith.mulf %21, %23 : vector<8x512xf32>
    %c496_i32 = arith.constant 496 : i32
    %25 = tpu.dynamic_rotate %0 by %c496_i32 dim 1 : vector<8x512xf32>, i32 -> vector<8x512xf32>
    %c7 = arith.constant 7 : index
    %c0_8 = arith.constant 0 : index
    %26 = vector.load %arg2[%c7, %c0_8] : memref<9x512xf32, #tpu.memory_space<vmem>>, vector<1x512xf32>
    %27 = vector.broadcast %26 : vector<1x512xf32> to vector<8x512xf32>
    %28 = arith.mulf %25, %27 : vector<8x512xf32>
    %c495_i32 = arith.constant 495 : i32
    %29 = tpu.dynamic_rotate %0 by %c495_i32 dim 1 : vector<8x512xf32>, i32 -> vector<8x512xf32>
    %c8 = arith.constant 8 : index
    %c0_9 = arith.constant 0 : index
    %30 = vector.load %arg2[%c8, %c0_9] : memref<9x512xf32, #tpu.memory_space<vmem>>, vector<1x512xf32>
    %31 = vector.broadcast %30 : vector<1x512xf32> to vector<8x512xf32>
    %32 = arith.mulf %29, %31 : vector<8x512xf32>
    %33 = tpu.concatenate %4, %8, %12, %16, %0, %20, %24, %28, %32 in 0 : vector<8x512xf32>, vector<8x512xf32>, vector<8x512xf32>, vector<8x512xf32>, vector<8x512xf32>, vector<8x512xf32>, vector<8x512xf32>, vector<8x512xf32>, vector<8x512xf32> -> vector<72x512xf32>
    %34 = arith.truncf %33 : vector<72x512xf32> to vector<72x512xbf16>
    %c0_10 = arith.constant 0 : index
    %c0_11 = arith.constant 0 : index
    %35 = vector.load %arg3[%c0_10, %c0_11] : memref<16x72xbf16, #tpu.memory_space<vmem>>, vector<16x72xbf16>
    %cst = arith.constant dense<0.000000e+00> : vector<16x512xf32>
    %36 = tpu.matmul %35, %34, %cst {dimension_numbers = #tpu.dot_dimension_numbers<[1], [0], [0], [1], [0, 0, 1, 1], [], []>} : vector<16x72xbf16>, vector<72x512xbf16>, vector<16x512xf32> -> vector<16x512xf32>
    %c0_12 = arith.constant 0 : index
    %c0_13 = arith.constant 0 : index
    %37 = vector.load %arg4[%c0_12, %c0_13] : memref<16x1xf32, #tpu.memory_space<vmem>>, vector<16x1xf32>
    %38 = vector.broadcast %37 : vector<16x1xf32> to vector<16x512xf32>
    %39 = arith.addf %36, %38 : vector<16x512xf32>
    %40 = arith.negf %39 : vector<16x512xf32>
    %41 = math.exp %40 : vector<16x512xf32>
    %cst_14 = arith.constant 1.000000e+00 : f32
    %42 = vector.broadcast %cst_14 : f32 to vector<16x512xf32>
    %43 = arith.addf %42, %41 : vector<16x512xf32>
    %44 = arith.divf %42, %43 : vector<16x512xf32>
    %45 = arith.mulf %39, %44 : vector<16x512xf32>
    %cst_15 = arith.constant 0.000000e+00 : f32
    %46 = vector.broadcast %cst_15 : f32 to vector<16x512xf32>
    %c17_i32_16 = arith.constant 17 : i32
    %47 = tpu.dynamic_rotate %45 by %c17_i32_16 dim 1 : vector<16x512xf32>, i32 -> vector<16x512xf32>
    %c0_17 = arith.constant 0 : index
    %c0_18 = arith.constant 0 : index
    %48 = vector.load %arg2[%c0_17, %c0_18] : memref<9x512xf32, #tpu.memory_space<vmem>>, vector<1x512xf32>
    %49 = vector.broadcast %48 : vector<1x512xf32> to vector<16x512xf32>
    %50 = arith.mulf %47, %49 : vector<16x512xf32>
    %c0_19 = arith.constant 0 : index
    %c0_20 = arith.constant 0 : index
    %c0_21 = arith.constant 0 : index
    %51 = vector.load %arg5[%c0_19, %c0_20, %c0_21] : memref<9x16x1xf32, #tpu.memory_space<vmem>>, vector<1x16x1xf32>
    %52 = vector.shape_cast %51 : vector<1x16x1xf32> to vector<16x1xf32>
    %53 = vector.broadcast %52 : vector<16x1xf32> to vector<16x512xf32>
    %54 = arith.mulf %53, %50 : vector<16x512xf32>
    %55 = arith.addf %46, %54 : vector<16x512xf32>
    %c16_i32_22 = arith.constant 16 : i32
    %56 = tpu.dynamic_rotate %45 by %c16_i32_22 dim 1 : vector<16x512xf32>, i32 -> vector<16x512xf32>
    %c1_23 = arith.constant 1 : index
    %c0_24 = arith.constant 0 : index
    %57 = vector.load %arg2[%c1_23, %c0_24] : memref<9x512xf32, #tpu.memory_space<vmem>>, vector<1x512xf32>
    %58 = vector.broadcast %57 : vector<1x512xf32> to vector<16x512xf32>
    %59 = arith.mulf %56, %58 : vector<16x512xf32>
    %c1_25 = arith.constant 1 : index
    %c0_26 = arith.constant 0 : index
    %c0_27 = arith.constant 0 : index
    %60 = vector.load %arg5[%c1_25, %c0_26, %c0_27] : memref<9x16x1xf32, #tpu.memory_space<vmem>>, vector<1x16x1xf32>
    %61 = vector.shape_cast %60 : vector<1x16x1xf32> to vector<16x1xf32>
    %62 = vector.broadcast %61 : vector<16x1xf32> to vector<16x512xf32>
    %63 = arith.mulf %62, %59 : vector<16x512xf32>
    %64 = arith.addf %55, %63 : vector<16x512xf32>
    %c15_i32_28 = arith.constant 15 : i32
    %65 = tpu.dynamic_rotate %45 by %c15_i32_28 dim 1 : vector<16x512xf32>, i32 -> vector<16x512xf32>
    %c2_29 = arith.constant 2 : index
    %c0_30 = arith.constant 0 : index
    %66 = vector.load %arg2[%c2_29, %c0_30] : memref<9x512xf32, #tpu.memory_space<vmem>>, vector<1x512xf32>
    %67 = vector.broadcast %66 : vector<1x512xf32> to vector<16x512xf32>
    %68 = arith.mulf %65, %67 : vector<16x512xf32>
    %c2_31 = arith.constant 2 : index
    %c0_32 = arith.constant 0 : index
    %c0_33 = arith.constant 0 : index
    %69 = vector.load %arg5[%c2_31, %c0_32, %c0_33] : memref<9x16x1xf32, #tpu.memory_space<vmem>>, vector<1x16x1xf32>
    %70 = vector.shape_cast %69 : vector<1x16x1xf32> to vector<16x1xf32>
    %71 = vector.broadcast %70 : vector<16x1xf32> to vector<16x512xf32>
    %72 = arith.mulf %71, %68 : vector<16x512xf32>
    %73 = arith.addf %64, %72 : vector<16x512xf32>
    %c1_i32_34 = arith.constant 1 : i32
    %74 = tpu.dynamic_rotate %45 by %c1_i32_34 dim 1 : vector<16x512xf32>, i32 -> vector<16x512xf32>
    %c3_35 = arith.constant 3 : index
    %c0_36 = arith.constant 0 : index
    %75 = vector.load %arg2[%c3_35, %c0_36] : memref<9x512xf32, #tpu.memory_space<vmem>>, vector<1x512xf32>
    %76 = vector.broadcast %75 : vector<1x512xf32> to vector<16x512xf32>
    %77 = arith.mulf %74, %76 : vector<16x512xf32>
    %c3_37 = arith.constant 3 : index
    %c0_38 = arith.constant 0 : index
    %c0_39 = arith.constant 0 : index
    %78 = vector.load %arg5[%c3_37, %c0_38, %c0_39] : memref<9x16x1xf32, #tpu.memory_space<vmem>>, vector<1x16x1xf32>
    %79 = vector.shape_cast %78 : vector<1x16x1xf32> to vector<16x1xf32>
    %80 = vector.broadcast %79 : vector<16x1xf32> to vector<16x512xf32>
    %81 = arith.mulf %80, %77 : vector<16x512xf32>
    %82 = arith.addf %73, %81 : vector<16x512xf32>
    %c4 = arith.constant 4 : index
    %c0_40 = arith.constant 0 : index
    %c0_41 = arith.constant 0 : index
    %83 = vector.load %arg5[%c4, %c0_40, %c0_41] : memref<9x16x1xf32, #tpu.memory_space<vmem>>, vector<1x16x1xf32>
    %84 = vector.shape_cast %83 : vector<1x16x1xf32> to vector<16x1xf32>
    %85 = vector.broadcast %84 : vector<16x1xf32> to vector<16x512xf32>
    %86 = arith.mulf %85, %45 : vector<16x512xf32>
    %87 = arith.addf %82, %86 : vector<16x512xf32>
    %c511_i32_42 = arith.constant 511 : i32
    %88 = tpu.dynamic_rotate %45 by %c511_i32_42 dim 1 : vector<16x512xf32>, i32 -> vector<16x512xf32>
    %c5_43 = arith.constant 5 : index
    %c0_44 = arith.constant 0 : index
    %89 = vector.load %arg2[%c5_43, %c0_44] : memref<9x512xf32, #tpu.memory_space<vmem>>, vector<1x512xf32>
    %90 = vector.broadcast %89 : vector<1x512xf32> to vector<16x512xf32>
    %91 = arith.mulf %88, %90 : vector<16x512xf32>
    %c5_45 = arith.constant 5 : index
    %c0_46 = arith.constant 0 : index
    %c0_47 = arith.constant 0 : index
    %92 = vector.load %arg5[%c5_45, %c0_46, %c0_47] : memref<9x16x1xf32, #tpu.memory_space<vmem>>, vector<1x16x1xf32>
    %93 = vector.shape_cast %92 : vector<1x16x1xf32> to vector<16x1xf32>
    %94 = vector.broadcast %93 : vector<16x1xf32> to vector<16x512xf32>
    %95 = arith.mulf %94, %91 : vector<16x512xf32>
    %96 = arith.addf %87, %95 : vector<16x512xf32>
    %c497_i32_48 = arith.constant 497 : i32
    %97 = tpu.dynamic_rotate %45 by %c497_i32_48 dim 1 : vector<16x512xf32>, i32 -> vector<16x512xf32>
    %c6_49 = arith.constant 6 : index
    %c0_50 = arith.constant 0 : index
    %98 = vector.load %arg2[%c6_49, %c0_50] : memref<9x512xf32, #tpu.memory_space<vmem>>, vector<1x512xf32>
    %99 = vector.broadcast %98 : vector<1x512xf32> to vector<16x512xf32>
    %100 = arith.mulf %97, %99 : vector<16x512xf32>
    %c6_51 = arith.constant 6 : index
    %c0_52 = arith.constant 0 : index
    %c0_53 = arith.constant 0 : index
    %101 = vector.load %arg5[%c6_51, %c0_52, %c0_53] : memref<9x16x1xf32, #tpu.memory_space<vmem>>, vector<1x16x1xf32>
    %102 = vector.shape_cast %101 : vector<1x16x1xf32> to vector<16x1xf32>
    %103 = vector.broadcast %102 : vector<16x1xf32> to vector<16x512xf32>
    %104 = arith.mulf %103, %100 : vector<16x512xf32>
    %105 = arith.addf %96, %104 : vector<16x512xf32>
    %c496_i32_54 = arith.constant 496 : i32
    %106 = tpu.dynamic_rotate %45 by %c496_i32_54 dim 1 : vector<16x512xf32>, i32 -> vector<16x512xf32>
    %c7_55 = arith.constant 7 : index
    %c0_56 = arith.constant 0 : index
    %107 = vector.load %arg2[%c7_55, %c0_56] : memref<9x512xf32, #tpu.memory_space<vmem>>, vector<1x512xf32>
    %108 = vector.broadcast %107 : vector<1x512xf32> to vector<16x512xf32>
    %109 = arith.mulf %106, %108 : vector<16x512xf32>
    %c7_57 = arith.constant 7 : index
    %c0_58 = arith.constant 0 : index
    %c0_59 = arith.constant 0 : index
    %110 = vector.load %arg5[%c7_57, %c0_58, %c0_59] : memref<9x16x1xf32, #tpu.memory_space<vmem>>, vector<1x16x1xf32>
    %111 = vector.shape_cast %110 : vector<1x16x1xf32> to vector<16x1xf32>
    %112 = vector.broadcast %111 : vector<16x1xf32> to vector<16x512xf32>
    %113 = arith.mulf %112, %109 : vector<16x512xf32>
    %114 = arith.addf %105, %113 : vector<16x512xf32>
    %c495_i32_60 = arith.constant 495 : i32
    %115 = tpu.dynamic_rotate %45 by %c495_i32_60 dim 1 : vector<16x512xf32>, i32 -> vector<16x512xf32>
    %c8_61 = arith.constant 8 : index
    %c0_62 = arith.constant 0 : index
    %116 = vector.load %arg2[%c8_61, %c0_62] : memref<9x512xf32, #tpu.memory_space<vmem>>, vector<1x512xf32>
    %117 = vector.broadcast %116 : vector<1x512xf32> to vector<16x512xf32>
    %118 = arith.mulf %115, %117 : vector<16x512xf32>
    %c8_63 = arith.constant 8 : index
    %c0_64 = arith.constant 0 : index
    %c0_65 = arith.constant 0 : index
    %119 = vector.load %arg5[%c8_63, %c0_64, %c0_65] : memref<9x16x1xf32, #tpu.memory_space<vmem>>, vector<1x16x1xf32>
    %120 = vector.shape_cast %119 : vector<1x16x1xf32> to vector<16x1xf32>
    %121 = vector.broadcast %120 : vector<16x1xf32> to vector<16x512xf32>
    %122 = arith.mulf %121, %118 : vector<16x512xf32>
    %123 = arith.addf %114, %122 : vector<16x512xf32>
    %c0_66 = arith.constant 0 : index
    %c0_67 = arith.constant 0 : index
    %124 = vector.load %arg6[%c0_66, %c0_67] : memref<16x1xf32, #tpu.memory_space<vmem>>, vector<16x1xf32>
    %125 = vector.broadcast %124 : vector<16x1xf32> to vector<16x512xf32>
    %126 = arith.addf %123, %125 : vector<16x512xf32>
    %127 = arith.negf %126 : vector<16x512xf32>
    %128 = math.exp %127 : vector<16x512xf32>
    %cst_68 = arith.constant 1.000000e+00 : f32
    %129 = vector.broadcast %cst_68 : f32 to vector<16x512xf32>
    %130 = arith.addf %129, %128 : vector<16x512xf32>
    %131 = arith.divf %129, %130 : vector<16x512xf32>
    %132 = arith.mulf %126, %131 : vector<16x512xf32>
    %133 = vector.extract_strided_slice %132 {offsets = [0, 0], sizes = [16, 256], strides = [1, 1]} : vector<16x512xf32> to vector<16x256xf32>
    %cst_69 = arith.constant dense<0.000000e+00> : vector<16xf32>
    %134 = vector.multi_reduction <add>, %133, %cst_69 [1] : vector<16x256xf32> to vector<16xf32>
    %135 = vector.shape_cast %134 : vector<16xf32> to vector<16x1xf32>
    %cst_70 = arith.constant 3.906250e-03 : f32
    %136 = vector.broadcast %cst_70 : f32 to vector<16x1xf32>
    %137 = arith.mulf %135, %136 : vector<16x1xf32>
    %c0_71 = arith.constant 0 : index
    %c0_72 = arith.constant 0 : index
    %138 = vector.load %arg7[%c0_71, %c0_72] : memref<16x2xf32, #tpu.memory_space<vmem>>, vector<16x2xf32>
    %139 = vector.broadcast %137 : vector<16x1xf32> to vector<16x2xf32>
    %140 = arith.mulf %138, %139 : vector<16x2xf32>
    %cst_73 = arith.constant dense<0.000000e+00> : vector<2xf32>
    %141 = vector.multi_reduction <add>, %140, %cst_73 [0] : vector<16x2xf32> to vector<2xf32>
    %142 = vector.shape_cast %141 : vector<2xf32> to vector<1x2xf32>
    %c0_74 = arith.constant 0 : index
    %c0_75 = arith.constant 0 : index
    %143 = vector.load %arg8[%c0_74, %c0_75] : memref<1x2xf32, #tpu.memory_space<vmem>>, vector<1x2xf32>
    %144 = arith.addf %142, %143 : vector<1x2xf32>
    %145 = arith.negf %144 : vector<1x2xf32>
    %146 = math.exp %145 : vector<1x2xf32>
    %cst_76 = arith.constant 1.000000e+00 : f32
    %147 = vector.broadcast %cst_76 : f32 to vector<1x2xf32>
    %148 = arith.addf %147, %146 : vector<1x2xf32>
    %149 = arith.divf %147, %148 : vector<1x2xf32>
    %150 = arith.mulf %144, %149 : vector<1x2xf32>
    %c0_77 = arith.constant 0 : index
    %c0_78 = arith.constant 0 : index
    %151 = vector.load %arg9[%c0_77, %c0_78] : memref<16x2xf32, #tpu.memory_space<vmem>>, vector<16x2xf32>
    %152 = vector.broadcast %150 : vector<1x2xf32> to vector<16x2xf32>
    %153 = arith.mulf %151, %152 : vector<16x2xf32>
    %cst_79 = arith.constant dense<0.000000e+00> : vector<16xf32>
    %154 = vector.multi_reduction <add>, %153, %cst_79 [1] : vector<16x2xf32> to vector<16xf32>
    %155 = vector.shape_cast %154 : vector<16xf32> to vector<16x1xf32>
    %c0_80 = arith.constant 0 : index
    %c0_81 = arith.constant 0 : index
    %156 = vector.load %arg10[%c0_80, %c0_81] : memref<16x1xf32, #tpu.memory_space<vmem>>, vector<16x1xf32>
    %157 = arith.addf %155, %156 : vector<16x1xf32>
    %158 = arith.negf %157 : vector<16x1xf32>
    %159 = math.exp %158 : vector<16x1xf32>
    %cst_82 = arith.constant 1.000000e+00 : f32
    %160 = vector.broadcast %cst_82 : f32 to vector<16x1xf32>
    %161 = arith.addf %160, %159 : vector<16x1xf32>
    %162 = arith.divf %160, %161 : vector<16x1xf32>
    %163 = vector.broadcast %162 : vector<16x1xf32> to vector<16x256xf32>
    %164 = arith.mulf %133, %163 : vector<16x256xf32>
    %165 = vector.extract_strided_slice %132 {offsets = [0, 256], sizes = [16, 256], strides = [1, 1]} : vector<16x512xf32> to vector<16x256xf32>
    %cst_83 = arith.constant dense<0.000000e+00> : vector<16xf32>
    %166 = vector.multi_reduction <add>, %165, %cst_83 [1] : vector<16x256xf32> to vector<16xf32>
    %167 = vector.shape_cast %166 : vector<16xf32> to vector<16x1xf32>
    %cst_84 = arith.constant 3.906250e-03 : f32
    %168 = vector.broadcast %cst_84 : f32 to vector<16x1xf32>
    %169 = arith.mulf %167, %168 : vector<16x1xf32>
    %c0_85 = arith.constant 0 : index
    %c0_86 = arith.constant 0 : index
    %170 = vector.load %arg7[%c0_85, %c0_86] : memref<16x2xf32, #tpu.memory_space<vmem>>, vector<16x2xf32>
    %171 = vector.broadcast %169 : vector<16x1xf32> to vector<16x2xf32>
    %172 = arith.mulf %170, %171 : vector<16x2xf32>
    %cst_87 = arith.constant dense<0.000000e+00> : vector<2xf32>
    %173 = vector.multi_reduction <add>, %172, %cst_87 [0] : vector<16x2xf32> to vector<2xf32>
    %174 = vector.shape_cast %173 : vector<2xf32> to vector<1x2xf32>
    %c0_88 = arith.constant 0 : index
    %c0_89 = arith.constant 0 : index
    %175 = vector.load %arg8[%c0_88, %c0_89] : memref<1x2xf32, #tpu.memory_space<vmem>>, vector<1x2xf32>
    %176 = arith.addf %174, %175 : vector<1x2xf32>
    %177 = arith.negf %176 : vector<1x2xf32>
    %178 = math.exp %177 : vector<1x2xf32>
    %cst_90 = arith.constant 1.000000e+00 : f32
    %179 = vector.broadcast %cst_90 : f32 to vector<1x2xf32>
    %180 = arith.addf %179, %178 : vector<1x2xf32>
    %181 = arith.divf %179, %180 : vector<1x2xf32>
    %182 = arith.mulf %176, %181 : vector<1x2xf32>
    %c0_91 = arith.constant 0 : index
    %c0_92 = arith.constant 0 : index
    %183 = vector.load %arg9[%c0_91, %c0_92] : memref<16x2xf32, #tpu.memory_space<vmem>>, vector<16x2xf32>
    %184 = vector.broadcast %182 : vector<1x2xf32> to vector<16x2xf32>
    %185 = arith.mulf %183, %184 : vector<16x2xf32>
    %cst_93 = arith.constant dense<0.000000e+00> : vector<16xf32>
    %186 = vector.multi_reduction <add>, %185, %cst_93 [1] : vector<16x2xf32> to vector<16xf32>
    %187 = vector.shape_cast %186 : vector<16xf32> to vector<16x1xf32>
    %c0_94 = arith.constant 0 : index
    %c0_95 = arith.constant 0 : index
    %188 = vector.load %arg10[%c0_94, %c0_95] : memref<16x1xf32, #tpu.memory_space<vmem>>, vector<16x1xf32>
    %189 = arith.addf %187, %188 : vector<16x1xf32>
    %190 = arith.negf %189 : vector<16x1xf32>
    %191 = math.exp %190 : vector<16x1xf32>
    %cst_96 = arith.constant 1.000000e+00 : f32
    %192 = vector.broadcast %cst_96 : f32 to vector<16x1xf32>
    %193 = arith.addf %192, %191 : vector<16x1xf32>
    %194 = arith.divf %192, %193 : vector<16x1xf32>
    %195 = vector.broadcast %194 : vector<16x1xf32> to vector<16x256xf32>
    %196 = arith.mulf %165, %195 : vector<16x256xf32>
    %197 = tpu.concatenate %164, %196 in 1 : vector<16x256xf32>, vector<16x256xf32> -> vector<16x512xf32>
    %c0_97 = arith.constant 0 : index
    %c0_98 = arith.constant 0 : index
    %198 = vector.load %arg11[%c0_97, %c0_98] : memref<8x16xbf16, #tpu.memory_space<vmem>>, vector<8x16xbf16>
    %199 = arith.truncf %197 : vector<16x512xf32> to vector<16x512xbf16>
    %cst_99 = arith.constant dense<0.000000e+00> : vector<8x512xf32>
    %200 = tpu.matmul %198, %199, %cst_99 {dimension_numbers = #tpu.dot_dimension_numbers<[1], [0], [0], [1], [0, 0, 1, 1], [], []>} : vector<8x16xbf16>, vector<16x512xbf16>, vector<8x512xf32> -> vector<8x512xf32>
    %c0_100 = arith.constant 0 : index
    %c0_101 = arith.constant 0 : index
    %201 = vector.load %arg12[%c0_100, %c0_101] : memref<8x1xf32, #tpu.memory_space<vmem>>, vector<8x1xf32>
    %202 = vector.broadcast %201 : vector<8x1xf32> to vector<8x512xf32>
    %203 = arith.addf %200, %202 : vector<8x512xf32>
    %204 = arith.addf %203, %0 : vector<8x512xf32>
    %c0_102 = arith.constant 0 : index
    %c0_103 = arith.constant 0 : index
    %205 = vector.load %arg13[%c0_102, %c0_103] : memref<8x512xf32, #tpu.memory_space<vmem>>, vector<8x512xf32>
    tpu.vector_store %arg13[%c0_102, %c0_103], %204 {strides = array<i32>} : memref<8x512xf32, #tpu.memory_space<vmem>>, vector<8x512xf32>,
    return
  }
  func.func @transform_0(%arg0: i32) -> (i32, i32) {
    %c0_i32 = arith.constant 0 : i32
    %c0_i32_0 = arith.constant 0 : i32
    return %c0_i32, %arg0 : i32, i32
  }
  func.func @transform_1(%arg0: i32) -> (i32, i32) {
    %c0_i32 = arith.constant 0 : i32
    %c0_i32_0 = arith.constant 0 : i32
    %c0_i32_1 = arith.constant 0 : i32
    return %c0_i32, %c0_i32_0 : i32, i32
  }
  func.func @transform_2(%arg0: i32) -> (i32, i32) {
    %c0_i32 = arith.constant 0 : i32
    %c0_i32_0 = arith.constant 0 : i32
    %c0_i32_1 = arith.constant 0 : i32
    return %c0_i32, %c0_i32_0 : i32, i32
  }
  func.func @transform_3(%arg0: i32) -> (i32, i32) {
    %c0_i32 = arith.constant 0 : i32
    %c0_i32_0 = arith.constant 0 : i32
    %c0_i32_1 = arith.constant 0 : i32
    return %c0_i32, %c0_i32_0 : i32, i32
  }
  func.func @transform_4(%arg0: i32) -> (i32, i32, i32) {
    %c0_i32 = arith.constant 0 : i32
    %c0_i32_0 = arith.constant 0 : i32
    %c0_i32_1 = arith.constant 0 : i32
    %c0_i32_2 = arith.constant 0 : i32
    return %c0_i32, %c0_i32_0, %c0_i32_1 : i32, i32, i32
  }
  func.func @transform_5(%arg0: i32) -> (i32, i32) {
    %c0_i32 = arith.constant 0 : i32
    %c0_i32_0 = arith.constant 0 : i32
    %c0_i32_1 = arith.constant 0 : i32
    return %c0_i32, %c0_i32_0 : i32, i32
  }
  func.func @transform_6(%arg0: i32) -> (i32, i32) {
    %c0_i32 = arith.constant 0 : i32
    %c0_i32_0 = arith.constant 0 : i32
    %c0_i32_1 = arith.constant 0 : i32
    return %c0_i32, %c0_i32_0 : i32, i32
  }
  func.func @transform_7(%arg0: i32) -> (i32, i32) {
    %c0_i32 = arith.constant 0 : i32
    %c0_i32_0 = arith.constant 0 : i32
    %c0_i32_1 = arith.constant 0 : i32
    return %c0_i32, %c0_i32_0 : i32, i32
  }
  func.func @transform_8(%arg0: i32) -> (i32, i32) {
    %c0_i32 = arith.constant 0 : i32
    %c0_i32_0 = arith.constant 0 : i32
    %c0_i32_1 = arith.constant 0 : i32
    return %c0_i32, %c0_i32_0 : i32, i32
  }
  func.func @transform_9(%arg0: i32) -> (i32, i32) {
    %c0_i32 = arith.constant 0 : i32
    %c0_i32_0 = arith.constant 0 : i32
    %c0_i32_1 = arith.constant 0 : i32
    return %c0_i32, %c0_i32_0 : i32, i32
  }
  func.func @transform_10(%arg0: i32) -> (i32, i32) {
    %c0_i32 = arith.constant 0 : i32
    %c0_i32_0 = arith.constant 0 : i32
    %c0_i32_1 = arith.constant 0 : i32
    return %c0_i32, %c0_i32_0 : i32, i32
  }
  func.func @transform_11(%arg0: i32) -> (i32, i32) {
    %c0_i32 = arith.constant 0 : i32
    %c0_i32_0 = arith.constant 0 : i32
    %c0_i32_1 = arith.constant 0 : i32
    return %c0_i32, %c0_i32_0 : i32, i32
  }
  func.func @transform_12(%arg0: i32) -> (i32, i32) {
    %c0_i32 = arith.constant 0 : i32
    %c0_i32_0 = arith.constant 0 : i32
    return %c0_i32, %arg0 : i32, i32
  }
}

</mosaic_0001>

<bundles_post_ra>
// kernel: inverted_residual_block.1
= control target key start
LH: loop header
LB: loop body
LE: loop exit
PB: predicated region body
PF: predicated region fallthrough
CT: control target
= control target key end

     0   :  { %s2093_s21 = smov 0   ;;  %s3187_s0 = inlined_call_operand.vmem [shape: f32[8,1024], index: 0, kind: input, shape index: {}]   ;;  %s3188_s1 = inlined_call_operand.vmem [shape: f32[9,512], index: 1, kind: input, shape index: {}]   ;;  %s3189_s2 = inlined_call_operand.vmem [shape: bf16[16,72], index: 2, kind: input, shape index: {}]   ;;  %s3190_s3 = inlined_call_operand.vmem [shape: f32[16,1], index: 3, kind: input, shape index: {}]   ;;  %s3191_s4 = inlined_call_operand.vmem [shape: f32[9,16,1], index: 4, kind: input, shape index: {}]   ;;  %s3192_s5 = inlined_call_operand.vmem [shape: f32[16,1], index: 5, kind: input, shape index: {}]   ;;  %s3193_s6 = inlined_call_operand.vmem [shape: f32[16,2], index: 6, kind: input, shape index: {}]   ;;  %s3194_s7 = inlined_call_operand.vmem [shape: f32[1,2], index: 7, kind: input, shape index: {}]   ;;  %s3195_s8 = inlined_call_operand.vmem [shape: f32[16,2], index: 8, kind: input, shape index: {}]   ;;  %s3196_s9 = inlined_call_operand.vmem [shape: f32[16,1], index: 9, kind: input, shape index: {}]   ;;  %s3197_s10 = inlined_call_operand.vmem [shape: bf16[8,16], index: 10, kind: input, shape index: {}]   ;;  %s3198_s11 = inlined_call_operand.vmem [shape: f32[8,1], index: 11, kind: input, shape index: {}]   ;;  %s3199_s12 = inlined_call_operand.vmem [shape: f32[8,1024], index: 12, kind: output, shape index: {}]  }
   0x1 LB: > { %s1836_s22 = sadd.s32 4294967295, %s2017_s21   ;;  %p1840_p0 = scmp.ge.s32.totalorder %s2017_s21, 1  ;;  %s2017_s21 = sphi %s2093_s21, %s22_s21  }
   0x2   : > { %p363_p1 = scmp.lt.s32.totalorder %s2017_s21, 3 }
   0x4   : > { %p364_p2 = pnand %p1840_p0, %p363_p1 }
   0x6   : > { %367 = sbr.rel (%p364_p2) target bundleno = 1451 (0x5ab), region = 68 }
   0xd   : > { %s1841_s23 = sshll.u32 %s1836_s22, 2  ;;  %s2019_s28 = smov 17   ;;  %v2026_v4 = vmov 0   ;;  %v766_v5 = vld [vmem:[%s3190_s3 + $0x8] sm:$0xff]  ;;  %v765_v6 = vld [vmem:[%s3190_s3] sm:$0xff]  ;;  %v1865_v9 = vld [vmem:[%s3191_s4 + $0x10] sm:$0xff]  ;;  %v430_v27 = vlaneseq }
   0xe   : > { %p406_p3 = scmp.lt.s32.totalorder %s1841_s23, 7  ;;  %s2020_s29 = smov 16   ;;  %831 = vmatprep.mubr.bf16.mxu0 %v2026_v4  ;;  %874 = vmatprep.mubr.bf16.mxu1 %v2026_v4  ;;  %v973_v7 = vld [vmem:[%s3191_s4] sm:$0xff]  ;;  %v974_v8 = vld [vmem:[%s3191_s4 + $0x8] sm:$0xff]  ;;  %v1866_v10 = vld [vmem:[%s3191_s4 + $0x18] sm:$0xff]  ;;  %vm786_vm8 = vcmask 1043456  }
   0xf   : > { %s2021_s30 = smov 15   ;;  %s2022_s13 = smov 1   ;;  %1917 = vset.pattern.permute.xlu1 %v2026_v4  ;;  %1916 = vset.pattern.permute.xlu0 %v2026_v4  ;;  %v1867_v11 = vld [vmem:[%s3191_s4 + $0x20] sm:$0xff]  ;;  %v1868_v12 = vld [vmem:[%s3191_s4 + $0x28] sm:$0xff]  ;;  %v1869_v13 = vld [vmem:[%s3191_s4 + $0x30] sm:$0xff]  ;;  %v440_v28 = vshrl.u32 %v430_v27, 7 }
  0x10   : > { %s3358_s23 = smov (!%p406_p3, %s1841_s23), 7  ;;  %s2023_s14 = smov 127   ;;  %v1870_v14 = vld [vmem:[%s3191_s4 + $0x38] sm:$0xff]  ;;  %v1871_v15 = vld [vmem:[%s3191_s4 + $0x40] sm:$0xff]  ;;  %v1872_v16 = vld [vmem:[%s3191_s4 + $0x48] sm:$0xff]  ;;  %v2257_v31 = vand.u32 127, %v430_v27 }
  0x11   : > { %s3200_s24 = sshll.u32 %s3358_s23, 3  ;;  %s3205_s15 = smov 113   ;;  %v1873_v17 = vld [vmem:[%s3191_s4 + $0x50] sm:$0xff]  ;;  %v1874_v18 = vld [vmem:[%s3191_s4 + $0x58] sm:$0xff]  ;;  %v1875_v19 = vld [vmem:[%s3191_s4 + $0x60] sm:$0xff]  ;;  %v2259_v32 = vsub.s32 1, %v440_v28 }
  0x12   : > { %s2109_s27 = scalar_lea.vmem %s3187_s0, %s3200_s24  ;;  %s3201_s16 = smov 112   ;;  %v1876_v20 = vld [vmem:[%s3191_s4 + $0x68] sm:$0xff]  ;;  %v1877_v21 = vld [vmem:[%s3191_s4 + $0x70] sm:$0xff]  ;;  %v1878_v22 = vld [vmem:[%s3191_s4 + $0x78] sm:$0xff]  ;;  %vm432_vm0 = vcmp.lt.s32.totalorder %v2257_v31, 17  ;;  %v2268_v37 = vsub.s32 0, %v440_v28 }
  0x13   : > { %v2112_v0 = vld [vmem:[%s2109_s27 + $0x10] sm:$0xff]  ;;  %v2115_v1 = vld [vmem:[%s2109_s27] sm:$0xff]  ;;  %v2122_v2 = vld [vmem:[%s2109_s27 + $0x18] sm:$0xff]  ;;  %s3203_s17 = smov 111   ;;  %v2270_v38 = vsub.s32 3, %v440_v28  ;;  %v2272_v39 = vsub.s32 2, %v440_v28 }
  0x14   : > { %426 = vrot.lane.b32.xlu1 %v2112_v0, %s2019_s28  ;;  %422 = vrot.lane.b32.xlu0 %v2115_v1, %s2019_s28  ;;  %v2125_v3 = vld [vmem:[%s2109_s27 + $0x8] sm:$0xff]  ;;  %v1879_v23 = vld [vmem:[%s3191_s4 + $0x80] sm:$0xff]  ;;  %3265 = vst [vmem:[#allocation2_spill] sm:$0xff] %v2268_v37  ;;  %vm471_vm1 = vcmp.lt.s32.totalorder %v2257_v31, 16  ;;  %vm511_vm2 = vcmp.lt.s32.totalorder %v2257_v31, 15  ;;  %vm551_vm3 = vcmp.lt.s32.totalorder %v2257_v31, 1 }
  0x15   : > { %v1880_v24 = vld [vmem:[%s3191_s4 + $0x88] sm:$0xff]  ;;  %v1457_v25 = vld [vmem:[%s3192_s5] sm:$0xff]  ;;  %vm591_vm4 = vcmp.lt.s32.totalorder %v2257_v31, 127  ;;  %vm671_vm5 = vcmp.lt.s32.totalorder %v2257_v31, 112  ;;  %vm631_vm6 = vcmp.lt.s32.totalorder %v2257_v31, 113  ;;  %vm711_vm7 = vcmp.lt.s32.totalorder %v2257_v31, 111 }
  0x16   : > { %v1458_v26 = vld [vmem:[%s3192_s5 + $0x8] sm:$0xff]  ;;  %vm782_vm9 = vcmask 588800   ;;  %s3282_s20 = smov 113   ;;  %s3283_s22 = smov 112   ;;  %vm1545_vm10 = vcmask 15360   ;;  %vm1686_vm11 = vcmask 130048  }
  0x17   : > { %v437_v33 = vld [vmem:[%s3188_s1] ss:$8 sm:$0xf]  ;;  %v1845_v34 = vld [vmem:[%s3188_s1 + $0x1] ss:$8 sm:$0xf] }
  0x18   : > { %428 = vrot.lane.b32.xlu1 %v2122_v2, %s2019_s28  ;;  %424 = vrot.lane.b32.xlu0 %v2125_v3, %s2019_s28  ;;  %v2276_v40 = vrot.slane %v437_v33, %v2259_v32  ;;  %v2279_v41 = vrot.slane %v1845_v34, %v2259_v32  ;;  %v2284_v45 = vrot.slane %v437_v33, %v2268_v37  ;;  %s3284_s25 = smov 111  }
  0x19   : > { %v2287_v46 = vrot.slane %v1845_v34, %v2268_v37  ;;  %v2290_v47 = vrot.slane %v437_v33, %v2270_v38  ;;  %v2297_v50 = vrot.slane %v1845_v34, %v2270_v38  ;;  %v2300_v51 = vrot.slane %v437_v33, %v2272_v39 }
  0x1a   : > { %v2307_v55 = vrot.slane %v1845_v34, %v2272_v39 }
  0x1c   : > { %465 = vrot.lane.b32.xlu1 %v2125_v3, %s2020_s29  ;;  %463 = vrot.lane.b32.xlu0 %v2115_v1, %s2020_s29 }
  0x20   : > { %469 = vrot.lane.b32.xlu1 %v2122_v2, %s2020_s29  ;;  %467 = vrot.lane.b32.xlu0 %v2112_v0, %s2020_s29 }
  0x24   : > { %505 = vrot.lane.b32.xlu1 %v2125_v3, %s2021_s30  ;;  %503 = vrot.lane.b32.xlu0 %v2115_v1, %s2021_s30 }
  0x28   : > { %509 = vrot.lane.b32.xlu1 %v2122_v2, %s2021_s30  ;;  %507 = vrot.lane.b32.xlu0 %v2112_v0, %s2021_s30 }
  0x2c   : > { %545 = vrot.lane.b32.xlu1 %v2125_v3, %s2022_s13  ;;  %543 = vrot.lane.b32.xlu0 %v2115_v1, %s2022_s13 }
  0x30   : > { %549 = vrot.lane.b32.xlu1 %v2122_v2, %s2022_s13  ;;  %547 = vrot.lane.b32.xlu0 %v2112_v0, %s2022_s13 }
  0x34   : > { %585 = vrot.lane.b32.xlu1 %v2125_v3, %s2023_s14  ;;  %583 = vrot.lane.b32.xlu0 %v2115_v1, %s2023_s14 }
  0x38   : > { %589 = vrot.lane.b32.xlu1 %v2122_v2, %s2023_s14  ;;  %587 = vrot.lane.b32.xlu0 %v2112_v0, %s2023_s14 }
  0x3c   : > { %625 = vrot.lane.b32.xlu1 %v2125_v3, %s3205_s15  ;;  %623 = vrot.lane.b32.xlu0 %v2115_v1, %s3205_s15 }
  0x40   : > { %629 = vrot.lane.b32.xlu1 %v2122_v2, %s3205_s15  ;;  %627 = vrot.lane.b32.xlu0 %v2112_v0, %s3205_s15 }
  0x44   : > { %665 = vrot.lane.b32.xlu1 %v2125_v3, %s3201_s16  ;;  %663 = vrot.lane.b32.xlu0 %v2115_v1, %s3201_s16 }
  0x48   : > { %669 = vrot.lane.b32.xlu1 %v2122_v2, %s3201_s16  ;;  %667 = vrot.lane.b32.xlu0 %v2112_v0, %s3201_s16 }
  0x4c   : > { %705 = vrot.lane.b32.xlu1 %v2125_v3, %s3203_s17  ;;  %703 = vrot.lane.b32.xlu0 %v2115_v1, %s3203_s17 }
  0x50   : > { %709 = vrot.lane.b32.xlu1 %v2122_v2, %s3203_s17  ;;  %707 = vrot.lane.b32.xlu0 %v2112_v0, %s3203_s17 }
  0x54   : > { %774 = vperm.xlu1 %1917, %v766_v5   ;;  %769 = vperm.xlu0 %1916, %v765_v6  }
  0x58   : > { %977 = vperm.xlu1 %1917, %v973_v7   ;;  %982 = vperm.xlu0 %1916, %v974_v8  }
  0x5c   : > { %1038 = vperm.xlu1 %1917, %v1865_v9   ;;  %1043 = vperm.xlu0 %1916, %v1866_v10  }
  0x60   : > { %1099 = vperm.xlu1 %1917, %v1867_v11   ;;  %1104 = vperm.xlu0 %1916, %v1868_v12  }
  0x64   : > { %1160 = vperm.xlu1 %1917, %v1869_v13   ;;  %1165 = vperm.xlu0 %1916, %v1870_v14  }
  0x68   : > { %1189 = vperm.xlu1 %1917, %v1871_v15   ;;  %1194 = vperm.xlu0 %1916, %v1872_v16   ;;  %v1846_v15 = vld [vmem:[%s3188_s1 + $0x2] ss:$8 sm:$0xf]  ;;  %v1847_v16 = vld [vmem:[%s3188_s1 + $0x3] ss:$8 sm:$0xf] }
  0x6c   : > { %1250 = vperm.xlu1 %1917, %v1873_v17   ;;  %1255 = vperm.xlu0 %1916, %v1874_v18  }
  0x70   : > { %1311 = vperm.xlu1 %1917, %v1875_v19   ;;  %1316 = vperm.xlu0 %1916, %v1876_v20   ;;  %v2331_v19 = vrot.slane %v1846_v15, %v2259_v32  ;;  %v2335_v20 = vrot.slane %v1847_v16, %v2259_v32 }
  0x74   : > { %1372 = vperm.xlu1 %1917, %v1877_v21   ;;  %1377 = vperm.xlu0 %1916, %v1878_v22   ;;  %v2340_v22 = vrot.slane %v1846_v15, %v2268_v37 }
  0x78   : > { %1433 = vperm.xlu1 %1917, %v1879_v23   ;;  %1438 = vperm.xlu0 %1916, %v1880_v24   ;;  %v2343_v23 = vrot.slane %v1846_v15, %v2272_v39  ;;  %v2346_v24 = vrot.slane %v1846_v15, %v2270_v38 }
  0x7c   : > { %1461 = vperm.xlu1 %1917, %v1457_v25   ;;  %1466 = vperm.xlu0 %1916, %v1458_v26  }
  0x86   : > { %v427_v29 = vpop.permute.xlu1 %426  ;;  %v423_v30 = vpop.permute.xlu0 %422 }
  0x8a   : > { %v429_v35 = vpop.permute.xlu1 %428  ;;  %v425_v36 = vpop.permute.xlu0 %424 }
  0x8b   : > { %v435_v42 = vsel %vm432_vm0, %v423_v30, %v425_v36  ;;  %v436_v48 = vsel %vm432_vm0, %v429_v35, %v423_v30  ;;  %v433_v54 = vsel %vm432_vm0, %v427_v29, %v429_v35  ;;  %v434_v56 = vsel %vm432_vm0, %v425_v36, %v427_v29 }
  0x8c   : > { %v460_v52 = vmul.f32 %v2276_v40, %v435_v42  ;;  %v459_v60 = vmul.f32 %v2284_v45, %v436_v48  ;;  %v462_v63 = vmul.f32 %v2290_v47, %v433_v54  ;;  %v461_v8 = vmul.f32 %v2300_v51, %v434_v56 }
  0x8d   : > { %v2353_v29 = vrot.slane %v1847_v16, %v2268_v37  ;;  %v2356_v30 = vrot.slane %v1847_v16, %v2272_v39  ;;  %v2363_v36 = vrot.slane %v1847_v16, %v2270_v38 }
  0x8e   : > { %v466_v43 = vpop.permute.xlu1 %465  ;;  %v464_v44 = vpop.permute.xlu0 %463 }
  0x8f   : > { %v474_v49 = vsel %vm471_vm1, %v464_v44, %v466_v43 }
  0x90   : > { %v500_v53 = vmul.f32 %v2279_v41, %v474_v49 }
  0x92   : > { %v470_v57 = vpop.permute.xlu1 %469  ;;  %v468_v58 = vpop.permute.xlu0 %467  ;;  %v744_v59 = vpack.c.bf16 %v500_v53, %v460_v52 }
  0x93   : > { %v475_v61 = vsel %vm471_vm1, %v470_v57, %v464_v44  ;;  %v473_v62 = vsel %vm471_vm1, %v466_v43, %v468_v58  ;;  %v472_v5 = vsel %vm471_vm1, %v468_v58, %v470_v57 }
  0x94   : > { %799 = vmatprep.subr.bf16.mxu0 %v744_v59  ;;  %v499_v6 = vmul.f32 %v2287_v46, %v475_v61  ;;  %v502_v7 = vmul.f32 %v2297_v50, %v472_v5  ;;  %v501_v9 = vmul.f32 %v2307_v55, %v473_v62  ;;  %v1848_v61 = vld [vmem:[%s3188_s1 + $0x5] ss:$8 sm:$0xf] }
  0x96   : > { %v506_v10 = vpop.permute.xlu1 %505  ;;  %v504_v11 = vpop.permute.xlu0 %503  ;;  %v743_v12 = vpack.c.bf16 %v499_v6, %v459_v60  ;;  %v746_v13 = vpack.c.bf16 %v502_v7, %v462_v63  ;;  %v745_v14 = vpack.c.bf16 %v501_v9, %v461_v8  ;;  %v2384_v8 = vrot.slane %v1848_v61, %v2268_v37 }
  0x97   : > { %v514_v21 = vsel %vm511_vm2, %v504_v11, %v506_v10  ;;  %v2387_v9 = vrot.slane %v1848_v61, %v2270_v38 }
  0x98   : > { %800 = vmatpush1.bf16.msra.mxu0 %v743_v12  ;;  %842 = vmatprep.subr.bf16.mxu1 %v746_v13  ;;  %v540_v33 = vmul.f32 %v2331_v19, %v514_v21  ;;  %3266 = vst [vmem:[#allocation3_spill] sm:$0xff] %v2384_v8  ;;  %v2395_v12 = vrot.slane %v1848_v61, %v2272_v39 }
  0x99   : > { %843 = vmatpush1.bf16.msra.mxu1 %v745_v14  ;;  %3267 = vst [vmem:[#allocation4_spill] sm:$0xff] %v2387_v9 }
  0x9a   : > { %v510_v17 = vpop.permute.xlu1 %509  ;;  %v508_v18 = vpop.permute.xlu0 %507  ;;  %3269 = vst [vmem:[#allocation6_spill] sm:$0xff] %v2395_v12 }
  0x9b   : > { %v515_v27 = vsel %vm511_vm2, %v510_v17, %v504_v11  ;;  %v513_v34 = vsel %vm511_vm2, %v506_v10, %v508_v18  ;;  %v512_v42 = vsel %vm511_vm2, %v508_v18, %v510_v17  ;;  %v2392_v11 = vrot.slane %v1848_v61, %v2259_v32 }
  0x9c   : > { %v539_v43 = vmul.f32 %v2340_v22, %v515_v27  ;;  %v541_v52 = vmul.f32 %v2343_v23, %v513_v34  ;;  %v542_v57 = vmul.f32 %v2346_v24, %v512_v42 }
  0x9d   : > { %3268 = vst [vmem:[#allocation5_spill] sm:$0xff] %v2392_v11 }
  0x9e   : > { %v546_v25 = vpop.permute.xlu1 %545  ;;  %v544_v26 = vpop.permute.xlu0 %543 }
  0x9f   : > { %v554_v28 = vsel %vm551_vm3, %v544_v26, %v546_v25 }
  0xa0   : > { %v580_v35 = vmul.f32 %v2335_v20, %v554_v28 }
  0xa2   : > { %v550_v44 = vpop.permute.xlu1 %549  ;;  %v548_v48 = vpop.permute.xlu0 %547  ;;  %v748_v49 = vpack.c.bf16 %v580_v35, %v540_v33 }
  0xa3   : > { %v555_v53 = vsel %vm551_vm3, %v550_v44, %v544_v26  ;;  %v552_v54 = vsel %vm551_vm3, %v548_v48, %v550_v44  ;;  %v553_v56 = vsel %vm551_vm3, %v546_v25, %v548_v48  ;;  %v1850_v48 = vld [vmem:[%s3188_s1 + $0x7] ss:$8 sm:$0xf] }
  0xa4   : > { %v579_v58 = vmul.f32 %v2353_v29, %v555_v53  ;;  %v581_v59 = vmul.f32 %v2356_v30, %v553_v56  ;;  %v582_v60 = vmul.f32 %v2363_v36, %v552_v54  ;;  %801 = vmatprep.subr.bf16.mxu0 %v748_v49  ;;  %v2433_v56 = vrot.slane %v1850_v48, %v2268_v37 }
  0xa5   : > { %v2447_v61 = vrot.slane %v1850_v48, %v2272_v39 }
  0xa6   : > { %v586_v62 = vpop.permute.xlu1 %585  ;;  %v584_v63 = vpop.permute.xlu0 %583  ;;  %v747_v5 = vpack.c.bf16 %v579_v58, %v539_v43  ;;  %v750_v6 = vpack.c.bf16 %v582_v60, %v542_v57  ;;  %v749_v7 = vpack.c.bf16 %v581_v59, %v541_v52  ;;  %3273 = vst [vmem:[#allocation10_spill] sm:$0xff] %v2433_v56  ;;  %v1851_v57 = vld [vmem:[%s3188_s1 + $0x20] ss:$8 sm:$0xf]  ;;  %v2441_v59 = vrot.slane %v1850_v48, %v2270_v38 }
  0xa7   : > { %v594_v10 = vsel %vm591_vm4, %v584_v63, %v586_v62  ;;  %v2444_v60 = vrot.slane %v1850_v48, %v2259_v32  ;;  %3276 = vst [vmem:[#allocation13_spill] sm:$0xff] %v2447_v61 }
  0xa8   : > { %802 = vmatpush1.bf16.msra.mxu0 %v747_v5  ;;  %844 = vmatprep.subr.bf16.mxu1 %v750_v6  ;;  %v619_v15 = vmul.f32 %v2384_v8, %v594_v10  ;;  %3274 = vst [vmem:[#allocation11_spill] sm:$0xff] %v2441_v59 }
  0xa9   : > { %845 = vmatpush1.bf16.msra.mxu1 %v749_v7  ;;  %3275 = vst [vmem:[#allocation12_spill] sm:$0xff] %v2444_v60 }
  0xaa   : > { %v590_v13 = vpop.permute.xlu1 %589  ;;  %v588_v14 = vpop.permute.xlu0 %587  ;;  %v751_v42 = vpack.c.bf16 %v619_v15, %v2115_v1 }
  0xab   : > { %v595_v16 = vsel %vm591_vm4, %v590_v13, %v584_v63  ;;  %v592_v17 = vsel %vm591_vm4, %v588_v14, %v590_v13  ;;  %v593_v18 = vsel %vm591_vm4, %v586_v62, %v588_v14  ;;  %v2460_v14 = vrot.slane %v1851_v57, %v2268_v37 }
  0xac   : > { %v622_v21 = vmul.f32 %v2387_v9, %v595_v16  ;;  %v620_v25 = vmul.f32 %v2392_v11, %v593_v18  ;;  %v621_v26 = vmul.f32 %v2395_v12, %v592_v17 }
  0xad   : > { %3278 = vst [vmem:[#allocation15_spill] sm:$0xff] %v2460_v14 }
  0xae   : > { %v626_v27 = vpop.permute.xlu1 %625  ;;  %v624_v28 = vpop.permute.xlu0 %623  ;;  %v752_v33 = vpack.c.bf16 %v620_v25, %v2125_v3  ;;  %v754_v34 = vpack.c.bf16 %v622_v21, %v2122_v2  ;;  %v753_v35 = vpack.c.bf16 %v621_v26, %v2112_v0  ;;  %v1849_v3 = vld [vmem:[%s3188_s1 + $0x6] ss:$8 sm:$0xf] }
  0xaf   : > { %v2420_v0 = vrot.slane %v1849_v3, %v2270_v38  ;;  %v2423_v1 = vrot.slane %v1849_v3, %v2259_v32  ;;  %v2428_v53 = vrot.slane %v1849_v3, %v2272_v39  ;;  %v2450_v62 = vrot.slane %v1849_v3, %v2268_v37 }
  0xb0   : > { %803 = vmatprep.subr.bf16.mxu0 %v752_v33  ;;  %846 = vmatprep.subr.bf16.mxu1 %v754_v34  ;;  %v634_v5 = vsel %vm631_vm6, %v624_v28, %v626_v27  ;;  %v2477_v3 = vrot.slane %v1851_v57, %v2270_v38 }
  0xb1   : > { %804 = vmatpush1.bf16.msra.mxu0 %v751_v42  ;;  %847 = vmatpush1.bf16.msra.mxu1 %v753_v35  ;;  %3270 = vst [vmem:[#allocation7_spill] sm:$0xff] %v2420_v0  ;;  %3271 = vst [vmem:[#allocation8_spill] sm:$0xff] %v2423_v1 }
  0xb2   : > { %v630_v43 = vpop.permute.xlu1 %629  ;;  %v628_v44 = vpop.permute.xlu0 %627  ;;  %3272 = vst [vmem:[#allocation9_spill] sm:$0xff] %v2428_v53  ;;  %3277 = vst [vmem:[#allocation14_spill] sm:$0xff] %v2450_v62 }
  0xb3   : > { %v635_v52 = vsel %vm631_vm6, %v630_v43, %v624_v28  ;;  %v633_v54 = vsel %vm631_vm6, %v626_v27, %v628_v44  ;;  %v632_v63 = vsel %vm631_vm6, %v628_v44, %v630_v43  ;;  %v659_v28 = vmul.f32 %v2450_v62, %v634_v5  ;;  %3279 = vst [vmem:[#allocation16_spill] sm:$0xff] %v2477_v3 }
  0xb4   : > { %v662_v6 = vmul.f32 %v2420_v0, %v635_v52  ;;  %v660_v7 = vmul.f32 %v2423_v1, %v633_v54  ;;  %v661_v21 = vmul.f32 %v2428_v53, %v632_v63  ;;  %v2484_v52 = vrot.slane %v1851_v57, %v2272_v39 }
  0xb6   : > { %v666_v2 = vpop.permute.xlu1 %665  ;;  %v664_v49 = vpop.permute.xlu0 %663  ;;  %3281 = vst [vmem:[#allocation18_spill] sm:$0xff] %v2484_v52 }
  0xb7   : > { %v674_v58 = vsel %vm671_vm5, %v664_v49, %v666_v2 }
  0xb8   : > { %v699_v15 = vmul.f32 %v2433_v56, %v674_v58 }
  0xba   : > { %v670_v10 = vpop.permute.xlu1 %669  ;;  %v668_v13 = vpop.permute.xlu0 %667  ;;  %v755_v48 = vpack.c.bf16 %v699_v15, %v659_v28 }
  0xbb   : > { %v675_v16 = vsel %vm671_vm5, %v670_v10, %v664_v49  ;;  %v672_v17 = vsel %vm671_vm5, %v668_v13, %v670_v10  ;;  %v673_v18 = vsel %vm671_vm5, %v666_v2, %v668_v13  ;;  %v2480_v2 = vrot.slane %v1851_v57, %v2259_v32 }
  0xbc   : > { %v702_v25 = vmul.f32 %v2441_v59, %v675_v16  ;;  %v700_v26 = vmul.f32 %v2444_v60, %v673_v18  ;;  %v701_v27 = vmul.f32 %v2447_v61, %v672_v17  ;;  %v1918_v17 = vld [vmem:[%s3189_s2] sm:$0xff]  }
  0xbd   : > { %3280 = vst [vmem:[#allocation17_spill] sm:$0xff] %v2480_v2 }
  0xbe   : > { %v706_v33 = vpop.permute.xlu1 %705  ;;  %v704_v34 = vpop.permute.xlu0 %703  ;;  %v756_v35 = vpack.c.bf16 %v700_v26, %v660_v7  ;;  %v758_v42 = vpack.c.bf16 %v702_v25, %v662_v6  ;;  %v757_v43 = vpack.c.bf16 %v701_v27, %v661_v21 }
  0xbf   : > { %v714_v44 = vsel %vm711_vm7, %v704_v34, %v706_v33 }
  0xc0   : > { %805 = vmatprep.subr.bf16.mxu0 %v756_v35  ;;  %848 = vmatprep.subr.bf16.mxu1 %v758_v42  ;;  %v739_v49 = vmul.f32 %v2460_v14, %v714_v44 }
  0xc1   : > { %806 = vmatpush1.bf16.msra.mxu0 %v755_v48  ;;  %849 = vmatpush1.bf16.msra.mxu1 %v757_v43 }
  0xc2   : > { %v710_v54 = vpop.permute.xlu1 %709  ;;  %v708_v58 = vpop.permute.xlu0 %707  ;;  %v759_v7 = vpack.c.bf16 %v739_v49, %v739_v49 }
  0xc3   : > { %v715_v63 = vsel %vm711_vm7, %v710_v54, %v704_v34  ;;  %v712_v38 = vsel %vm711_vm7, %v708_v58, %v710_v54  ;;  %v713_v5 = vsel %vm711_vm7, %v706_v33, %v708_v58 }
  0xc4   : > { %v742_v32 = vmul.f32 %v2477_v3, %v715_v63  ;;  %v740_v6 = vmul.f32 %v2480_v2, %v713_v5  ;;  %v741_v39 = vmul.f32 %v2484_v52, %v712_v38  ;;  %v788_v15 = vsel %vm786_vm8, %v759_v7, 0 }
  0xc6   : > { %v762_v57 = vpack.c.bf16 %v742_v32, %v742_v32  ;;  %v760_v10 = vpack.c.bf16 %v740_v6, %v740_v6  ;;  %v761_v13 = vpack.c.bf16 %v741_v39, %v741_v39 }
  0xc8   : > { %1853 = vmatprep.subr.msk.bf16.mxu0 %vm786_vm8, %v760_v10  ;;  %1855 = vmatprep.subr.msk.bf16.mxu1 %vm786_vm8, %v762_v57  ;;  %v794_v16 = vsel %vm786_vm8, %v761_v13, 0 }
  0xc9   : > { %808 = vmatpush1.bf16.msra.mxu0 %v788_v15  ;;  %851 = vmatpush1.bf16.msra.mxu1 %v794_v16 }
  0xcc   : > { %1854 = vmatmul.mubr.msk.bf16.vlgmr.msra.gmra.mrb[0].mxu0 %vm782_vm9, %v1918_v17  ;;  %1856 = vmatmul.mubr.msk.bf16.vlgmr.msra.gmra.mrb[0].mxu1 %vm782_vm9, %v1918_v17 }
  0xcd   : > { %1722 = vmatprep.mubr.bf16.mxu0 %v2026_v4  ;;  %1763 = vmatprep.mubr.bf16.mxu1 %v2026_v4 }
  0xd3   : > { %v2500_v18 = vpop.permute.xlu1 %774  ;;  %v770_v21 = vpop.permute.xlu0 %769 }
 0x19f   : > { %v833_v25 = vpop.f32.mrb[0].mxu0  ;;  %v876_v26 = vpop.f32.mrb[0].mxu1 }
 0x1a0   : > { %v834_v27 = vadd.f32 %v833_v25, %v770_v21  ;;  %v877_v28 = vadd.f32 %v876_v26, %v770_v21  ;;  %v835_v33 = vpop.f32.mrb[1].mxu0  ;;  %v878_v34 = vpop.f32.mrb[1].mxu1 }
 0x1a1   : > { %v837_v35 = vpop.f32.mrb[2].mxu0  ;;  %v880_v42 = vpop.f32.mrb[2].mxu1 }
 0x1a2   : > { %v1857_v43 = vmul.f32 -1.442695, %v834_v27  ;;  %v1859_v44 = vmul.f32 -1.442695, %v877_v28  ;;  %v838_v48 = vadd.f32 %v837_v35, %v2500_v18  ;;  %v881_v49 = vadd.f32 %v880_v42, %v2500_v18  ;;  %v839_v54 = vpop.f32.mrb[3].mxu0  ;;  %v882_v58 = vpop.f32.mrb[3].mxu1 }
 0x1a3   : > { %v879_v42 = vadd.f32 %v878_v34, %v770_v21 }
 0x1a4   : > { %1919 = vpow2.f32 %v1857_v43  ;;  %v1861_v4 = vmul.f32 -1.442695, %v838_v48  ;;  %v1863_v63 = vmul.f32 -1.442695, %v881_v49 }
 0x1a5   : > { %1921 = vpow2.f32 %v1859_v44  ;;  %v840_v44 = vadd.f32 %v839_v54, %v2500_v18 }
 0x1a6   : > { %1923 = vpow2.f32 %v1861_v4 }
 0x1a7   : > { %1925 = vpow2.f32 %v1863_v63 }
 0x1ae   : > { %v1920_v38 = vpop.eup %1919 }
 0x1af   : > { %v909_v5 = vadd.f32 1.0, %v1920_v38  ;;  %v1922_v32 = vpop.eup %1921 }
 0x1b0   : > { %v1924_v6 = vpop.eup %1923  ;;  %v911_v7 = vadd.f32 1.0, %v1922_v32  ;;  %v2568_v32 = vpop.permute.xlu1 %977 }
 0x1b1   : > { %1927 = vrcp.f32 %v909_v5  ;;  %v913_v39 = vadd.f32 1.0, %v1924_v6  ;;  %v1926_v57 = vpop.eup %1925 }
 0x1b2   : > { %v915_v10 = vadd.f32 1.0, %v1926_v57 }
 0x1b3   : > { %1929 = vrcp.f32 %v913_v39 }
 0x1b4   : > { %1931 = vrcp.f32 %v911_v7  ;;  %v2574_v7 = vpop.permute.xlu0 %982  ;;  %v2580_v57 = vpop.permute.xlu1 %1038 }
 0x1b5   : > { %1933 = vrcp.f32 %v915_v10 }
 0x1bb   : > { %v1928_v13 = vpop.eup %1927 }
 0x1bc   : > { %v2504_v15 = vmul.f32 %v1928_v13, %v834_v27 }
 0x1bd   : > { %v1930_v16 = vpop.eup %1929 }
 0x1be   : > { %941 = vrot.lane.b32.xlu1 %v2504_v15, %s2019_s28  ;;  %v2508_v17 = vmul.f32 %v1930_v16, %v838_v48  ;;  %v1932_v25 = vpop.eup %1931  ;;  %v1860_v48 = vmul.f32 -1.442695, %v879_v42  ;;  %v2588_v16 = vpop.permute.xlu0 %1043 }
 0x1bf   : > { %v2514_v26 = vmul.f32 %v1932_v25, %v877_v28  ;;  %v1934_v35 = vpop.eup %1933  ;;  %v836_v28 = vadd.f32 %v835_v33, %v770_v21  ;;  %v883_v33 = vadd.f32 %v882_v58, %v2500_v18 }
 0x1c0   : > { %943 = vrot.lane.b32.xlu0 %v2508_v17, %s2019_s28  ;;  %v2520_v27 = vmul.f32 %v1934_v35, %v881_v49  ;;  %v1862_v49 = vmul.f32 -1.442695, %v840_v44 }
 0x1c1   : > { %v1858_v43 = vmul.f32 -1.442695, %v836_v28  ;;  %v1864_v21 = vmul.f32 -1.442695, %v883_v33 }
 0x1c2   : > { %1001 = vrot.lane.b32.xlu1 %v2504_v15, %s2020_s29 }
 0x1c3   : > { %1935 = vpow2.f32 %v1858_v43 }
 0x1c4   : > { %1003 = vrot.lane.b32.xlu0 %v2508_v17, %s2020_s29  ;;  %1937 = vpow2.f32 %v1860_v48  ;;  %v2594_v48 = vpop.permute.xlu1 %1099 }
 0x1c5   : > { %1939 = vpow2.f32 %v1862_v49  ;;  %v2602_v49 = vpop.permute.xlu0 %1104 }
 0x1c6   : > { %949 = vrot.lane.b32.xlu1 %v2514_v26, %s2019_s28  ;;  %1941 = vpow2.f32 %v1864_v21 }
 0x1c8   : > { %951 = vrot.lane.b32.xlu0 %v2520_v27, %s2019_s28 }
 0x1ca   : > { %1009 = vrot.lane.b32.xlu1 %v2514_v26, %s2020_s29 }
 0x1cc   : > { %1011 = vrot.lane.b32.xlu0 %v2520_v27, %s2020_s29 }
 0x1cd   : > { %v1936_v18 = vpop.eup %1935 }
 0x1ce   : > { %1062 = vrot.lane.b32.xlu1 %v2504_v15, %s2021_s30  ;;  %v1938_v34 = vpop.eup %1937  ;;  %v910_v54 = vadd.f32 1.0, %v1936_v18 }
 0x1cf   : > { %v1940_v58 = vpop.eup %1939  ;;  %v912_v4 = vadd.f32 1.0, %v1938_v34 }
 0x1d0   : > { %1064 = vrot.lane.b32.xlu0 %v2508_v17, %s2021_s30  ;;  %1943 = vrcp.f32 %v910_v54  ;;  %v914_v63 = vadd.f32 1.0, %v1940_v58  ;;  %v1942_v38 = vpop.eup %1941 }
 0x1d1   : > { %1945 = vrcp.f32 %v912_v4  ;;  %v916_v5 = vadd.f32 1.0, %v1942_v38 }
 0x1d2   : > { %1070 = vrot.lane.b32.xlu1 %v2514_v26, %s2021_s30  ;;  %1947 = vrcp.f32 %v914_v63 }
 0x1d3   : > { %1949 = vrcp.f32 %v916_v5 }
 0x1d4   : > { %1072 = vrot.lane.b32.xlu0 %v2520_v27, %s2021_s30 }
 0x1d6   : > { %1123 = vrot.lane.b32.xlu1 %v2504_v15, %s2022_s13 }
 0x1d8   : > { %1125 = vrot.lane.b32.xlu0 %v2508_v17, %s2022_s13 }
 0x1da   : > { %1131 = vrot.lane.b32.xlu1 %v2514_v26, %s2022_s13  ;;  %v1944_v6 = vpop.eup %1943 }
 0x1db   : > { %v1946_v39 = vpop.eup %1945  ;;  %v2582_v10 = vmul.f32 %v1944_v6, %v836_v28 }
 0x1dc   : > { %1133 = vrot.lane.b32.xlu0 %v2520_v27, %s2022_s13  ;;  %v1948_v13 = vpop.eup %1947  ;;  %v2590_v25 = vmul.f32 %v1946_v39, %v879_v42  ;;  %v2608_v42 = vpop.permute.xlu1 %1160 }
 0x1dd   : > { %v2592_v35 = vmul.f32 %v1948_v13, %v840_v44  ;;  %v1950_v43 = vpop.eup %1949  ;;  %v2614_v44 = vpop.permute.xlu0 %1165 }
 0x1de   : > { %1213 = vrot.lane.b32.xlu1 %v2504_v15, %s2023_s14  ;;  %v2600_v28 = vmul.f32 %v1950_v43, %v883_v33 }
 0x1e0   : > { %1215 = vrot.lane.b32.xlu0 %v2508_v17, %s2023_s14  ;;  %v2616_v33 = vpop.permute.xlu1 %1189 }
 0x1e1   : > { %v2622_v21 = vpop.permute.xlu0 %1194 }
 0x1e2   : > { %1221 = vrot.lane.b32.xlu1 %v2514_v26, %s2023_s14 }
 0x1e4   : > { %1223 = vrot.lane.b32.xlu0 %v2520_v27, %s2023_s14  ;;  %v2628_v18 = vpop.permute.xlu1 %1250 }
 0x1e5   : > { %3285 = vst [vmem:[#allocation19_spill] sm:$0xff] %v2628_v18  ;;  %v2634_v34 = vpop.permute.xlu0 %1255 }
 0x1e6   : > { %1274 = vrot.lane.b32.xlu1 %v2504_v15, %s3282_s20  ;;  %3286 = vst [vmem:[#allocation20_spill] sm:$0xff] %v2634_v34 }
 0x1e8   : > { %1276 = vrot.lane.b32.xlu0 %v2508_v17, %s3282_s20  ;;  %v2636_v54 = vpop.permute.xlu1 %1311 }
 0x1e9   : > { %3287 = vst [vmem:[#allocation21_spill] sm:$0xff] %v2636_v54  ;;  %v2642_v58 = vpop.permute.xlu0 %1316 }
 0x1ea   : > { %1282 = vrot.lane.b32.xlu1 %v2514_v26, %s3282_s20  ;;  %3288 = vst [vmem:[#allocation22_spill] sm:$0xff] %v2642_v58 }
 0x1ec   : > { %1284 = vrot.lane.b32.xlu0 %v2520_v27, %s3282_s20  ;;  %v2648_v4 = vpop.permute.xlu1 %1372 }
 0x1ed   : > { %3289 = vst [vmem:[#allocation23_spill] sm:$0xff] %v2648_v4  ;;  %v2654_v63 = vpop.permute.xlu0 %1377 }
 0x1ee   : > { %1335 = vrot.lane.b32.xlu1 %v2504_v15, %s3283_s22  ;;  %3290 = vst [vmem:[#allocation24_spill] sm:$0xff] %v2654_v63 }
 0x1f0   : > { %1337 = vrot.lane.b32.xlu0 %v2508_v17, %s3283_s22  ;;  %v2656_v38 = vpop.permute.xlu1 %1433 }
 0x1f1   : > { %3291 = vst [vmem:[#allocation25_spill] sm:$0xff] %v2656_v38  ;;  %v2662_v5 = vpop.permute.xlu0 %1438 }
 0x1f2   : > { %1343 = vrot.lane.b32.xlu1 %v2514_v26, %s3283_s22  ;;  %3292 = vst [vmem:[#allocation26_spill] sm:$0xff] %v2662_v5 }
 0x1f4   : > { %1345 = vrot.lane.b32.xlu0 %v2520_v27, %s3283_s22  ;;  %v2668_v6 = vpop.permute.xlu1 %1461 }
 0x1f5   : > { %3293 = vst [vmem:[#allocation27_spill] sm:$0xff] %v2668_v6  ;;  %v2674_v39 = vpop.permute.xlu0 %1466 }
 0x1f6   : > { %1396 = vrot.lane.b32.xlu1 %v2504_v15, %s3284_s25  ;;  %3294 = vst [vmem:[#allocation28_spill] sm:$0xff] %v2674_v39 }
 0x1f8   : > { %1398 = vrot.lane.b32.xlu0 %v2508_v17, %s3284_s25 }
 0x1fa   : > { %1404 = vrot.lane.b32.xlu1 %v2514_v26, %s3284_s25 }
 0x1fc   : > { %1406 = vrot.lane.b32.xlu0 %v2520_v27, %s3284_s25 }
 0x1fe   : > { %945 = vrot.lane.b32.xlu1 %v2582_v10, %s2019_s28 }
 0x200   : > { %947 = vrot.lane.b32.xlu0 %v2592_v35, %s2019_s28 }
 0x202   : > { %953 = vrot.lane.b32.xlu1 %v2590_v25, %s2019_s28 }
 0x204   : > { %955 = vrot.lane.b32.xlu0 %v2600_v28, %s2019_s28 }
 0x206   : > { %1005 = vrot.lane.b32.xlu1 %v2582_v10, %s2020_s29 }
 0x208   : > { %1007 = vrot.lane.b32.xlu0 %v2592_v35, %s2020_s29 }
 0x20a   : > { %1013 = vrot.lane.b32.xlu1 %v2590_v25, %s2020_s29 }
 0x20c   : > { %1015 = vrot.lane.b32.xlu0 %v2600_v28, %s2020_s29 }
 0x20e   : > { %1066 = vrot.lane.b32.xlu1 %v2582_v10, %s2021_s30 }
 0x210   : > { %1068 = vrot.lane.b32.xlu0 %v2592_v35, %s2021_s30 }
 0x212   : > { %1074 = vrot.lane.b32.xlu1 %v2590_v25, %s2021_s30 }
 0x214   : > { %1076 = vrot.lane.b32.xlu0 %v2600_v28, %s2021_s30 }
 0x216   : > { %1127 = vrot.lane.b32.xlu1 %v2582_v10, %s2022_s13 }
 0x218   : > { %1129 = vrot.lane.b32.xlu0 %v2592_v35, %s2022_s13 }
 0x21a   : > { %1135 = vrot.lane.b32.xlu1 %v2590_v25, %s2022_s13 }
 0x21c   : > { %1137 = vrot.lane.b32.xlu0 %v2600_v28, %s2022_s13  ;;  %s3356_s13 = sshll.u32 %s3358_s23, 3 }
 0x21d   : > { %s415_s24 = scalar_lea.vmem %s3199_s12, %s3356_s13 }
 0x21e   : > { %1217 = vrot.lane.b32.xlu1 %v2582_v10, %s2023_s14 }
 0x220   : > { %1219 = vrot.lane.b32.xlu0 %v2592_v35, %s2023_s14 }
 0x222   : > { %1225 = vrot.lane.b32.xlu1 %v2590_v25, %s2023_s14 }
 0x224   : > { %1227 = vrot.lane.b32.xlu0 %v2600_v28, %s2023_s14 }
 0x226   : > { %1278 = vrot.lane.b32.xlu1 %v2582_v10, %s3282_s20 }
 0x228   : > { %1280 = vrot.lane.b32.xlu0 %v2592_v35, %s3282_s20 }
 0x22a   : > { %1286 = vrot.lane.b32.xlu1 %v2590_v25, %s3282_s20 }
 0x22c   : > { %1288 = vrot.lane.b32.xlu0 %v2600_v28, %s3282_s20 }
 0x22e   : > { %1339 = vrot.lane.b32.xlu1 %v2582_v10, %s3283_s22 }
 0x230   : > { %v942_v13 = vpop.permute.xlu1 %941  ;;  %1341 = vrot.lane.b32.xlu0 %v2592_v35, %s3283_s22 }
 0x232   : > { %1347 = vrot.lane.b32.xlu1 %v2590_v25, %s3283_s22  ;;  %v944_v43 = vpop.permute.xlu0 %943 }
 0x234   : > { %v2680_v37 = vpop.permute.xlu1 %1001  ;;  %1349 = vrot.lane.b32.xlu0 %v2600_v28, %s3283_s22 }
 0x236   : > { %1400 = vrot.lane.b32.xlu1 %v2582_v10, %s3284_s25  ;;  %v2686_v6 = vpop.permute.xlu0 %1003 }
 0x238   : > { %v950_v3 = vpop.permute.xlu1 %949  ;;  %1402 = vrot.lane.b32.xlu0 %v2592_v35, %s3284_s25 }
 0x23a   : > { %1408 = vrot.lane.b32.xlu1 %v2590_v25, %s3284_s25  ;;  %v952_v39 = vpop.permute.xlu0 %951 }
 0x23c   : > { %v2692_v52 = vpop.permute.xlu1 %1009  ;;  %1410 = vrot.lane.b32.xlu0 %v2600_v28, %s3284_s25 }
 0x23e   : > { %v2696_v5 = vpop.permute.xlu0 %1011 }
 0x240   : > { %v2698_v38 = vpop.permute.xlu1 %1062 }
 0x242   : > { %v2700_v2 = vpop.permute.xlu0 %1064 }
 0x244   : > { %v2702_v14 = vpop.permute.xlu1 %1070 }
 0x246   : > { %v2704_v59 = vpop.permute.xlu0 %1072 }
 0x248   : > { %v2706_v61 = vpop.permute.xlu1 %1123 }
 0x24a   : > { %v2708_v63 = vpop.permute.xlu0 %1125 }
 0x24c   : > { %v2710_v4 = vpop.permute.xlu1 %1131 }
 0x24e   : > { %v2712_v60 = vpop.permute.xlu0 %1133 }
 0x250   : > { %v2714_v56 = vpop.permute.xlu1 %1213 }
 0x252   : > { %v2716_v0 = vpop.permute.xlu0 %1215 }
 0x253   : > { %3295 = vst [vmem:[#allocation29_spill] sm:$0xff] %v2716_v0 }
 0x254   : > { %v2718_v53 = vpop.permute.xlu1 %1221 }
 0x256   : > { %v2720_v58 = vpop.permute.xlu0 %1223 }
 0x257   : > { %3296 = vst [vmem:[#allocation30_spill] sm:$0xff] %v2720_v58 }
 0x258   : > { %v2722_v54 = vpop.permute.xlu1 %1274 }
 0x259   : > { %3297 = vst [vmem:[#allocation31_spill] sm:$0xff] %v2722_v54 }
 0x25a   : > { %v2724_v1 = vpop.permute.xlu0 %1276 }
 0x25b   : > { %3298 = vst [vmem:[#allocation32_spill] sm:$0xff] %v2724_v1 }
 0x25c   : > { %v2726_v62 = vpop.permute.xlu1 %1282 }
 0x25d   : > { %3299 = vst [vmem:[#allocation33_spill] sm:$0xff] %v2726_v62 }
 0x25e   : > { %v2728_v9 = vpop.permute.xlu0 %1284 }
 0x25f   : > { %3300 = vst [vmem:[#allocation34_spill] sm:$0xff] %v2728_v9 }
 0x260   : > { %v2730_v12 = vpop.permute.xlu1 %1335 }
 0x261   : > { %3301 = vst [vmem:[#allocation35_spill] sm:$0xff] %v2730_v12 }
 0x262   : > { %v2732_v34 = vpop.permute.xlu0 %1337 }
 0x263   : > { %3302 = vst [vmem:[#allocation36_spill] sm:$0xff] %v2732_v34 }
 0x264   : > { %v2734_v18 = vpop.permute.xlu1 %1343 }
 0x265   : > { %3303 = vst [vmem:[#allocation37_spill] sm:$0xff] %v2734_v18 }
 0x266   : > { %v2736_v8 = vpop.permute.xlu0 %1345 }
 0x267   : > { %3304 = vst [vmem:[#allocation38_spill] sm:$0xff] %v2736_v8  ;;  %v2752_v8 = vmul.f32 %v2616_v33, %v2504_v15 }
 0x268   : > { %v2738_v0 = vpop.permute.xlu1 %1396 }
 0x269   : > { %3305 = vst [vmem:[#allocation39_spill] sm:$0xff] %v2738_v0 }
 0x26a   : > { %v2740_v11 = vpop.permute.xlu0 %1398 }
 0x26b   : > { %3306 = vst [vmem:[#allocation40_spill] sm:$0xff] %v2740_v11  ;;  %v2756_v11 = vmul.f32 %v2616_v33, %v2514_v26 }
 0x26c   : > { %v2742_v58 = vpop.permute.xlu1 %1404 }
 0x26d   : > { %3307 = vst [vmem:[#allocation41_spill] sm:$0xff] %v2742_v58  ;;  %v2765_v58 = vmul.f32 %v2622_v21, %v2508_v17 }
 0x26e   : > { %v2744_v54 = vpop.permute.xlu0 %1406 }
 0x26f   : > { %3308 = vst [vmem:[#allocation42_spill] sm:$0xff] %v2744_v54  ;;  %v2761_v54 = vmul.f32 %v2616_v33, %v2582_v10  ;;  %3309 = vst [vmem:[#allocation43_spill] sm:$0xff] %v2765_v58  ;;  %v2780_v10 = vmul.f32 %v2622_v21, %v2520_v27  ;;  %v2790_v58 = vmul.f32 %v2622_v21, %v2600_v28 }
 0x270   : > { %v946_v1 = vpop.permute.xlu1 %945 }
 0x271   : > { %v961_v9 = vsel %vm432_vm0, %v942_v13, %v946_v1  ;;  %v959_v12 = vsel %vm432_vm0, %v946_v1, %v950_v3  ;;  %v2769_v1 = vmul.f32 %v2616_v33, %v2590_v25  ;;  %3310 = vst [vmem:[#allocation44_spill] sm:$0xff] %v2780_v10  ;;  %3311 = vst [vmem:[#allocation45_spill] sm:$0xff] %v2790_v58 }
 0x272   : > { %v948_v34 = vpop.permute.xlu0 %947  ;;  %v966_v0 = vmul.f32 %v961_v9, %v2276_v40  ;;  %v967_v15 = vmul.f32 %v959_v12, %v2300_v51  ;;  %v2776_v9 = vmul.f32 %v2622_v21, %v2592_v35 }
 0x273   : > { %v962_v26 = vsel %vm432_vm0, %v944_v43, %v948_v34  ;;  %v960_v17 = vsel %vm432_vm0, %v948_v34, %v952_v39 }
 0x274   : > { %v954_v62 = vpop.permute.xlu1 %953 }
 0x275   : > { %v957_v25 = vsel %vm432_vm0, %v950_v3, %v954_v62  ;;  %v963_v12 = vsel %vm432_vm0, %v954_v62, %v942_v13  ;;  %v986_v3 = vmul.f32 %v2568_v32, %v966_v0  ;;  %v970_v13 = vmul.f32 %v962_v26, %v2276_v40 }
 0x276   : > { %v956_v33 = vpop.permute.xlu0 %955  ;;  %v968_v58 = vmul.f32 %v957_v25, %v2290_v47 }
 0x277   : > { %v958_v35 = vsel %vm432_vm0, %v952_v39, %v956_v33  ;;  %v964_v27 = vsel %vm432_vm0, %v956_v33, %v944_v43  ;;  %v987_v39 = vmul.f32 %v2568_v32, %v967_v15  ;;  %v971_v43 = vmul.f32 %v960_v17, %v2300_v51 }
 0x278   : > { %v1006_v18 = vpop.permute.xlu1 %1005  ;;  %v965_v33 = vmul.f32 %v963_v12, %v2284_v45  ;;  %v969_v10 = vmul.f32 %v964_v27, %v2284_v45  ;;  %v990_v17 = vmul.f32 %v2574_v7, %v970_v13 }
 0x279   : > { %v1019_v34 = vsel %vm471_vm1, %v1006_v18, %v2692_v52  ;;  %v1021_v62 = vsel %vm471_vm1, %v2680_v37, %v1006_v18  ;;  %v972_v18 = vmul.f32 %v958_v35, %v2290_v47  ;;  %v991_v27 = vmul.f32 %v2574_v7, %v971_v43 }
 0x27a   : > { %v1026_v28 = vmul.f32 %v1021_v62, %v2279_v41  ;;  %v1027_v21 = vmul.f32 %v1019_v34, %v2307_v55  ;;  %v1008_v26 = vpop.permute.xlu0 %1007  ;;  %v985_v34 = vmul.f32 %v2568_v32, %v965_v33 }
 0x27b   : > { %v1020_v15 = vsel %vm471_vm1, %v1008_v26, %v2696_v5  ;;  %v1022_v51 = vsel %vm471_vm1, %v2686_v6, %v1008_v26  ;;  %v989_v26 = vmul.f32 %v2574_v7, %v969_v10 }
 0x27c   : > { %v1047_v0 = vmul.f32 %v2580_v57, %v1026_v28  ;;  %v1048_v40 = vmul.f32 %v2580_v57, %v1027_v21  ;;  %v1014_v62 = vpop.permute.xlu1 %1013  ;;  %v1030_v12 = vmul.f32 %v1022_v51, %v2279_v41  ;;  %v1031_v35 = vmul.f32 %v1020_v15, %v2307_v55 }
 0x27d   : > { %v1017_v45 = vsel %vm471_vm1, %v2692_v52, %v1014_v62  ;;  %v1023_v47 = vsel %vm471_vm1, %v1014_v62, %v2680_v37  ;;  %v988_v52 = vmul.f32 %v2568_v32, %v968_v58  ;;  %v992_v37 = vmul.f32 %v2574_v7, %v972_v18 }
 0x27e   : > { %v1056_v25 = vadd.f32 %v1048_v40, %v987_v39  ;;  %v1025_v28 = vmul.f32 %v1023_v47, %v2287_v46  ;;  %v1028_v21 = vmul.f32 %v1017_v45, %v2297_v50  ;;  %v1052_v13 = vmul.f32 %v2588_v16, %v1031_v35  ;;  %v1016_v39 = vpop.permute.xlu0 %1015 }
 0x27f   : > { %v1055_v40 = vadd.f32 %v1047_v0, %v986_v3  ;;  %v1018_v43 = vsel %vm471_vm1, %v2696_v5, %v1016_v39  ;;  %v1024_v33 = vsel %vm471_vm1, %v1016_v39, %v2686_v6  ;;  %v1051_v32 = vmul.f32 %v2588_v16, %v1030_v12 }
 0x280   : > { %v1067_v41 = vpop.permute.xlu1 %1066  ;;  %v1049_v55 = vmul.f32 %v2580_v57, %v1028_v21  ;;  %v1060_v58 = vadd.f32 %v1052_v13, %v991_v27  ;;  %v1029_v7 = vmul.f32 %v1024_v33, %v2287_v46  ;;  %v1032_v10 = vmul.f32 %v1018_v43, %v2297_v50 }
 0x281   : > { %v1046_v18 = vmul.f32 %v2580_v57, %v1025_v28  ;;  %v1080_v0 = vsel %vm511_vm2, %v1067_v41, %v2702_v14  ;;  %v1082_v5 = vsel %vm511_vm2, %v2698_v38, %v1067_v41  ;;  %v1059_v12 = vadd.f32 %v1051_v32, %v990_v17 }
 0x282   : > { %v1057_v3 = vadd.f32 %v1049_v55, %v988_v52  ;;  %v1050_v6 = vmul.f32 %v2588_v16, %v1029_v7  ;;  %v1053_v62 = vmul.f32 %v2588_v16, %v1032_v10  ;;  %v1087_v15 = vmul.f32 %v1082_v5, %v2331_v19  ;;  %v1069_v50 = vpop.permute.xlu0 %1068 }
 0x283   : > { %v1088_v46 = vmul.f32 %v1080_v0, %v2343_v23  ;;  %v1081_v57 = vsel %vm511_vm2, %v1069_v50, %v2704_v59  ;;  %v1083_v45 = vsel %vm511_vm2, %v2700_v2, %v1069_v50  ;;  %v1054_v41 = vadd.f32 %v1046_v18, %v985_v34 }
 0x284   : > { %v1075_v51 = vpop.permute.xlu1 %1074  ;;  %v1061_v35 = vadd.f32 %v1053_v62, %v992_v37  ;;  %v1108_v27 = vmul.f32 %v2594_v48, %v1087_v15  ;;  %v1091_v21 = vmul.f32 %v1083_v45, %v2331_v19  ;;  %v1092_v52 = vmul.f32 %v1081_v57, %v2343_v23 }
 0x285   : > { %v1078_v47 = vsel %vm511_vm2, %v2702_v14, %v1075_v51  ;;  %v1084_v16 = vsel %vm511_vm2, %v1075_v51, %v2698_v38  ;;  %v1109_v28 = vmul.f32 %v2594_v48, %v1088_v46  ;;  %v1058_v14 = vadd.f32 %v1050_v6, %v989_v26 }
 0x286   : > { %v1086_v13 = vmul.f32 %v1084_v16, %v2340_v22  ;;  %v1089_v39 = vmul.f32 %v1078_v47, %v2346_v24  ;;  %v1116_v55 = vadd.f32 %v1108_v27, %v1055_v40  ;;  %v1077_v33 = vpop.permute.xlu0 %1076  ;;  %v1112_v17 = vmul.f32 %v2602_v49, %v1091_v21 }
 0x287   : > { %v1117_v43 = vadd.f32 %v1109_v28, %v1056_v25  ;;  %v1113_v37 = vmul.f32 %v2602_v49, %v1092_v52  ;;  %v1079_v23 = vsel %vm511_vm2, %v2704_v59, %v1077_v33  ;;  %v1085_v34 = vsel %vm511_vm2, %v1077_v33, %v2700_v2 }
 0x288   : > { %v1128_v38 = vpop.permute.xlu1 %1127  ;;  %v1107_v32 = vmul.f32 %v2594_v48, %v1086_v13  ;;  %v1110_v19 = vmul.f32 %v2594_v48, %v1089_v39  ;;  %v1120_v40 = vadd.f32 %v1112_v17, %v1059_v12  ;;  %v1090_v18 = vmul.f32 %v1085_v34, %v2340_v22  ;;  %v3314_v34 = vld [vmem:[#allocation30_spill] sm:$0xff] }
 0x289   : > { %v1141_v25 = vsel %vm551_vm3, %v1128_v38, %v2710_v4  ;;  %v1143_v26 = vsel %vm551_vm3, %v2706_v61, %v1128_v38  ;;  %v1121_v7 = vadd.f32 %v1113_v37, %v1060_v58  ;;  %v1093_v59 = vmul.f32 %v1079_v23, %v2346_v24  ;;  %v3312_v38 = vld [vmem:[#allocation5_spill] sm:$0xff] }
 0x28a   : > { %v1115_v10 = vadd.f32 %v1107_v32, %v1054_v41  ;;  %v1118_v48 = vadd.f32 %v1110_v19, %v1057_v3  ;;  %v1148_v0 = vmul.f32 %v1143_v26, %v2335_v20  ;;  %v1149_v2 = vmul.f32 %v1141_v25, %v2356_v30  ;;  %v1130_v5 = vpop.permute.xlu0 %1129  ;;  %v3313_v32 = vld [vmem:[#allocation3_spill] sm:$0xff] }
 0x28b   : > { %v1142_v62 = vsel %vm551_vm3, %v1130_v5, %v2712_v60  ;;  %v1144_v58 = vsel %vm551_vm3, %v2708_v63, %v1130_v5  ;;  %v1111_v3 = vmul.f32 %v2602_v49, %v1090_v18  ;;  %v1114_v15 = vmul.f32 %v2602_v49, %v1093_v59  ;;  %v3315_v26 = vld [vmem:[#allocation19_spill] sm:$0xff] }
 0x28c   : > { %v1136_v6 = vpop.permute.xlu1 %1135  ;;  %v1169_v46 = vmul.f32 %v2608_v42, %v1148_v0  ;;  %v1170_v50 = vmul.f32 %v2608_v42, %v1149_v2  ;;  %v1152_v51 = vmul.f32 %v1144_v58, %v2335_v20  ;;  %v1153_v57 = vmul.f32 %v1142_v62, %v2356_v30  ;;  %v3317_v58 = vld [vmem:[#allocation20_spill] sm:$0xff] }
 0x28d   : > { %v1139_v22 = vsel %vm551_vm3, %v2710_v4, %v1136_v6  ;;  %v1145_v24 = vsel %vm551_vm3, %v1136_v6, %v2706_v61  ;;  %v1119_v47 = vadd.f32 %v1111_v3, %v1058_v14  ;;  %v1122_v16 = vadd.f32 %v1114_v15, %v1061_v35  ;;  %v3318_v15 = vld [vmem:[#allocation43_spill] sm:$0xff] }
 0x28e   : > { %v1147_v45 = vmul.f32 %v1145_v24, %v2353_v29  ;;  %v1150_v4 = vmul.f32 %v1139_v22, %v2363_v36  ;;  %v1177_v12 = vadd.f32 %v1169_v46, %v1116_v55  ;;  %v1178_v61 = vadd.f32 %v1170_v50, %v1117_v43  ;;  %v1138_v27 = vpop.permute.xlu0 %1137  ;;  %v3319_v50 = vld [vmem:[#allocation6_spill] sm:$0xff] }
 0x28f   : > { %v1173_v49 = vmul.f32 %v2614_v44, %v1152_v51  ;;  %v1174_v21 = vmul.f32 %v2614_v44, %v1153_v57  ;;  %v1140_v30 = vsel %vm551_vm3, %v2712_v60, %v1138_v27  ;;  %v1146_v35 = vsel %vm551_vm3, %v1138_v27, %v2708_v63 }
 0x290   : > { %v1218_v28 = vpop.permute.xlu1 %1217  ;;  %v1168_v52 = vmul.f32 %v2608_v42, %v1147_v45  ;;  %v1171_v20 = vmul.f32 %v2608_v42, %v1150_v4  ;;  %v1206_v13 = vadd.f32 %v2761_v54, %v1177_v12  ;;  %v1151_v42 = vmul.f32 %v1146_v35, %v2353_v29  ;;  %v3321_v4 = vld [vmem:[#allocation4_spill] sm:$0xff] }
 0x291   : > { %v1231_v39 = vsel %vm591_vm4, %v1218_v28, %v2718_v53  ;;  %v1181_v41 = vadd.f32 %v1173_v49, %v1120_v40  ;;  %v1182_v14 = vadd.f32 %v1174_v21, %v1121_v7  ;;  %v1154_v33 = vmul.f32 %v1140_v30, %v2363_v36  ;;  %v3316_v7 = vld [vmem:[#allocation29_spill] sm:$0xff] }
 0x292   : > { %v1176_v55 = vadd.f32 %v1168_v52, %v1115_v10  ;;  %v1179_v43 = vadd.f32 %v1171_v20, %v1118_v48  ;;  %v1233_v60 = vsel %vm591_vm4, %v2714_v56, %v1218_v28  ;;  %v1238_v63 = vmul.f32 %v1231_v39, %v3312_v38  ;;  %v1220_v17 = vpop.permute.xlu0 %1219  ;;  %v3323_v30 = vld [vmem:[#allocation33_spill] sm:$0xff] }
 0x293   : > { %v1237_v19 = vmul.f32 %v1233_v60, %v3313_v32  ;;  %v1210_v23 = vadd.f32 %v2776_v9, %v1181_v41  ;;  %v1232_v29 = vsel %vm591_vm4, %v1220_v17, %v3314_v34  ;;  %v1172_v36 = vmul.f32 %v2614_v44, %v1151_v42  ;;  %v3326_v42 = vld [vmem:[#allocation8_spill] sm:$0xff] }
 0x294   : > { %v1226_v54 = vpop.permute.xlu1 %1225  ;;  %v1205_v37 = vadd.f32 %v2752_v8, %v1176_v55  ;;  %v1175_v25 = vmul.f32 %v2614_v44, %v1154_v33  ;;  %v1259_v40 = vmul.f32 %v3315_v26, %v1238_v63  ;;  %v1234_v10 = vsel %vm591_vm4, %v3316_v7, %v1220_v17  ;;  %v3325_v55 = vld [vmem:[#allocation14_spill] sm:$0xff] }
 0x295   : > { %v1258_v8 = vmul.f32 %v3315_v26, %v1237_v19  ;;  %v1241_v48 = vmul.f32 %v1234_v10, %v3313_v32  ;;  %v1242_v9 = vmul.f32 %v1232_v29, %v3312_v38  ;;  %v1207_v18 = vadd.f32 %v2756_v11, %v1178_v61  ;;  %v3327_v63 = vld [vmem:[#allocation34_spill] sm:$0xff]  ;;  %v3329_v19 = vld [vmem:[#allocation21_spill] sm:$0xff] }
 0x296   : > { %v1180_v59 = vadd.f32 %v1172_v36, %v1119_v47  ;;  %v1183_v0 = vadd.f32 %v1175_v25, %v1122_v16  ;;  %v1267_v2 = vadd.f32 %v1259_v40, %v1206_v13  ;;  %v1208_v5 = vadd.f32 %v2769_v1, %v1179_v43  ;;  %v1228_v44 = vpop.permute.xlu0 %1227  ;;  %v3320_v1 = vld [vmem:[#allocation44_spill] sm:$0xff]  ;;  %v3322_v16 = vld [vmem:[#allocation45_spill] sm:$0xff]  ;;  %v3324_v13 = vld [vmem:[#allocation31_spill] sm:$0xff] }
 0x297   : > { %v1266_v62 = vadd.f32 %v1258_v8, %v1205_v37  ;;  %v1262_v22 = vmul.f32 %v3317_v58, %v1241_v48  ;;  %v1263_v24 = vmul.f32 %v3317_v58, %v1242_v9  ;;  %v1229_v3 = vsel %vm591_vm4, %v2718_v53, %v1226_v54  ;;  %v3330_v9 = vld [vmem:[#allocation22_spill] sm:$0xff] }
 0x298   : > { %v1279_v6 = vpop.permute.xlu1 %1278  ;;  %v1209_v46 = vadd.f32 %v3318_v15, %v1180_v59  ;;  %v1235_v11 = vsel %vm591_vm4, %v1226_v54, %v2714_v56  ;;  %v1239_v51 = vmul.f32 %v1229_v3, %v3319_v50  ;;  %v1211_v57 = vadd.f32 %v3320_v1, %v1182_v14  ;;  %v3328_v54 = vld [vmem:[#allocation32_spill] sm:$0xff]  ;;  %v3331_v59 = vld [vmem:[#allocation9_spill] sm:$0xff] }
 0x299   : > { %v1271_v45 = vadd.f32 %v1263_v24, %v1210_v23  ;;  %v1240_v47 = vmul.f32 %v1235_v11, %v3321_v4  ;;  %v1212_v12 = vadd.f32 %v3322_v16, %v1183_v0  ;;  %v1230_v61 = vsel %vm591_vm4, %v3314_v34, %v1228_v44 }
 0x29a   : > { %v1270_v53 = vadd.f32 %v1262_v22, %v1209_v46  ;;  %v1260_v27 = vmul.f32 %v3315_v26, %v1239_v51  ;;  %v1236_v56 = vsel %vm591_vm4, %v1228_v44, %v3316_v7  ;;  %v1243_v28 = vmul.f32 %v1230_v61, %v3319_v50  ;;  %v1281_v49 = vpop.permute.xlu0 %1280  ;;  %v3332_v44 = vld [vmem:[#allocation7_spill] sm:$0xff]  ;;  %v3333_v51 = vld [vmem:[#allocation37_spill] sm:$0xff]  ;;  %v3335_v61 = vld [vmem:[#allocation10_spill] sm:$0xff] }
 0x29b   : > { %v1261_v52 = vmul.f32 %v3315_v26, %v1240_v47  ;;  %v1244_v20 = vmul.f32 %v1236_v56, %v3321_v4  ;;  %v1292_v35 = vsel %vm631_vm6, %v1279_v6, %v3323_v30  ;;  %v1294_v39 = vsel %vm631_vm6, %v3324_v13, %v1279_v6  ;;  %v3336_v56 = vld [vmem:[#allocation12_spill] sm:$0xff] }
 0x29c   : > { %v1287_v21 = vpop.permute.xlu1 %1286  ;;  %v1268_v41 = vadd.f32 %v1260_v27, %v1207_v18  ;;  %v1264_v14 = vmul.f32 %v3317_v58, %v1243_v28  ;;  %v1298_v43 = vmul.f32 %v1294_v39, %v3325_v55  ;;  %v1299_v33 = vmul.f32 %v1292_v35, %v3326_v42  ;;  %v3337_v28 = vld [vmem:[#allocation38_spill] sm:$0xff]  ;;  %v3339_v35 = vld [vmem:[#allocation23_spill] sm:$0xff] }
 0x29d   : > { %v1269_v60 = vadd.f32 %v1261_v52, %v1208_v5  ;;  %v1265_v38 = vmul.f32 %v3317_v58, %v1244_v20  ;;  %v1293_v17 = vsel %vm631_vm6, %v1281_v49, %v3327_v63  ;;  %v1295_v37 = vsel %vm631_vm6, %v3328_v54, %v1281_v49 }
 0x29e   : > { %v1272_v32 = vadd.f32 %v1264_v14, %v1211_v57  ;;  %v1319_v23 = vmul.f32 %v3329_v19, %v1298_v43  ;;  %v1320_v34 = vmul.f32 %v3329_v19, %v1299_v33  ;;  %v1302_v29 = vmul.f32 %v1295_v37, %v3325_v55  ;;  %v1289_v36 = vpop.permute.xlu0 %1288  ;;  %v3334_v57 = vld [vmem:[#allocation35_spill] sm:$0xff] }
 0x29f   : > { %v1273_v26 = vadd.f32 %v1265_v38, %v1212_v12  ;;  %v1303_v40 = vmul.f32 %v1293_v17, %v3326_v42  ;;  %v1290_v7 = vsel %vm631_vm6, %v3323_v30, %v1287_v21  ;;  %v1296_v10 = vsel %vm631_vm6, %v1287_v21, %v3324_v13  ;;  %v3338_v21 = vld [vmem:[#allocation36_spill] sm:$0xff]  ;;  %v3341_v17 = vld [vmem:[#allocation13_spill] sm:$0xff]  ;;  %v3342_v37 = vld [vmem:[#allocation11_spill] sm:$0xff] }
 0x2a0   : > { %v1340_v25 = vpop.permute.xlu1 %1339  ;;  %v1327_v8 = vadd.f32 %v1319_v23, %v1266_v62  ;;  %v1328_v48 = vadd.f32 %v1320_v34, %v1267_v2  ;;  %v1323_v18 = vmul.f32 %v3330_v9, %v1302_v29  ;;  %v1300_v0 = vmul.f32 %v1290_v7, %v3331_v59  ;;  %v3340_v38 = vld [vmem:[#allocation24_spill] sm:$0xff] }
 0x2a1   : > { %v1324_v5 = vmul.f32 %v3330_v9, %v1303_v40  ;;  %v1301_v6 = vmul.f32 %v1296_v10, %v3332_v44  ;;  %v1291_v58 = vsel %vm631_vm6, %v3327_v63, %v1289_v36  ;;  %v1297_v22 = vsel %vm631_vm6, %v1289_v36, %v3328_v54 }
 0x2a2   : > { %v1331_v24 = vadd.f32 %v1323_v18, %v1270_v53  ;;  %v1321_v62 = vmul.f32 %v3329_v19, %v1300_v0  ;;  %v1304_v2 = vmul.f32 %v1291_v58, %v3331_v59  ;;  %v1305_v3 = vmul.f32 %v1297_v22, %v3332_v44  ;;  %v1342_v15 = vpop.permute.xlu0 %1341  ;;  %v3344_v18 = vld [vmem:[#allocation39_spill] sm:$0xff] }
 0x2a3   : > { %v1332_v11 = vadd.f32 %v1324_v5, %v1271_v45  ;;  %v1322_v50 = vmul.f32 %v3329_v19, %v1301_v6  ;;  %v1353_v1 = vsel %vm671_vm5, %v1340_v25, %v3333_v51  ;;  %v1355_v4 = vsel %vm671_vm5, %v3334_v57, %v1340_v25  ;;  %v3345_v6 = vld [vmem:[#allocation15_spill] sm:$0xff] }
 0x2a4   : > { %v1348_v46 = vpop.permute.xlu1 %1347  ;;  %v1329_v47 = vadd.f32 %v1321_v62, %v1268_v41  ;;  %v1325_v16 = vmul.f32 %v3330_v9, %v1304_v2  ;;  %v1326_v12 = vmul.f32 %v3330_v9, %v1305_v3  ;;  %v1359_v53 = vmul.f32 %v1355_v4, %v3335_v61  ;;  %v3346_v62 = vld [vmem:[#allocation17_spill] sm:$0xff]  ;;  %v3347_v3 = vld [vmem:[#allocation42_spill] sm:$0xff] }
 0x2a5   : > { %v1330_v27 = vadd.f32 %v1322_v50, %v1269_v60  ;;  %v1360_v45 = vmul.f32 %v1353_v1, %v3336_v56  ;;  %v1354_v49 = vsel %vm671_vm5, %v1342_v15, %v3337_v28  ;;  %v1356_v52 = vsel %vm671_vm5, %v3338_v21, %v1342_v15 }
 0x2a6   : > { %v1333_v20 = vadd.f32 %v1325_v16, %v1272_v32  ;;  %v1334_v30 = vadd.f32 %v1326_v12, %v1273_v26  ;;  %v1380_v13 = vmul.f32 %v3339_v35, %v1359_v53  ;;  %v1363_v39 = vmul.f32 %v1356_v52, %v3335_v61  ;;  %v1350_v41 = vpop.permute.xlu0 %1349 }
 0x2a7   : > { %v1381_v55 = vmul.f32 %v3339_v35, %v1360_v45  ;;  %v1364_v43 = vmul.f32 %v1354_v49, %v3336_v56  ;;  %v1351_v42 = vsel %vm671_vm5, %v3333_v51, %v1348_v46  ;;  %v1357_v33 = vsel %vm671_vm5, %v1348_v46, %v3334_v57  ;;  %v3348_v46 = vld [vmem:[#allocation40_spill] sm:$0xff]  ;;  %v3349_v51 = vld [vmem:[#allocation25_spill] sm:$0xff]  ;;  %v3350_v56 = vld [vmem:[#allocation26_spill] sm:$0xff] }
 0x2a8   : > { %v1401_v14 = vpop.permute.xlu1 %1400  ;;  %v1388_v60 = vadd.f32 %v1380_v13, %v1327_v8  ;;  %v1384_v63 = vmul.f32 %v3340_v38, %v1363_v39  ;;  %v1361_v54 = vmul.f32 %v1351_v42, %v3341_v17  ;;  %v1362_v32 = vmul.f32 %v1357_v33, %v3342_v37  ;;  %v3351_v49 = vld [vmem:[#allocation18_spill] sm:$0xff]  ;;  %v3353_v33 = vld [vmem:[#allocation27_spill] sm:$0xff] }
 0x2a9   : > { %v1389_v19 = vadd.f32 %v1381_v55, %v1328_v48  ;;  %v1385_v23 = vmul.f32 %v3340_v38, %v1364_v43  ;;  %v1352_v34 = vsel %vm671_vm5, %v3337_v28, %v1350_v41  ;;  %v1358_v29 = vsel %vm671_vm5, %v1350_v41, %v3338_v21  ;;  %v3343_v48 = vld [vmem:[#allocation41_spill] sm:$0xff] }
 0x2aa   : > { %v1392_v36 = vadd.f32 %v1384_v63, %v1331_v24  ;;  %v1382_v25 = vmul.f32 %v3339_v35, %v1361_v54  ;;  %v1383_v26 = vmul.f32 %v3339_v35, %v1362_v32  ;;  %v1365_v40 = vmul.f32 %v1352_v34, %v3341_v17  ;;  %v1403_v7 = vpop.permute.xlu0 %1402  ;;  %v3354_v54 = vld [vmem:[#allocation28_spill] sm:$0xff] }
 0x2ab   : > { %v1393_v10 = vadd.f32 %v1385_v23, %v1332_v11  ;;  %v1366_v8 = vmul.f32 %v1358_v29, %v3342_v37  ;;  %v1414_v9 = vsel %vm711_vm7, %v1401_v14, %v3343_v48  ;;  %v1416_v59 = vsel %vm711_vm7, %v3344_v18, %v1401_v14 }
 0x2ac   : > { %v1390_v0 = vadd.f32 %v1382_v25, %v1329_v47  ;;  %v1391_v5 = vadd.f32 %v1383_v26, %v1330_v27  ;;  %v1386_v44 = vmul.f32 %v3340_v38, %v1365_v40  ;;  %v1420_v58 = vmul.f32 %v1416_v59, %v3345_v6  ;;  %v1409_v22 = vpop.permute.xlu1 %1408 }
 0x2ad   : > { %v1387_v24 = vmul.f32 %v3340_v38, %v1366_v8  ;;  %v1421_v2 = vmul.f32 %v1414_v9, %v3346_v62  ;;  %v1415_v15 = vsel %vm711_vm7, %v1403_v7, %v3347_v3  ;;  %v1417_v11 = vsel %vm711_vm7, %v3348_v46, %v1403_v7 }
 0x2ae   : > { %v1394_v50 = vadd.f32 %v1386_v44, %v1333_v20  ;;  %v1441_v1 = vmul.f32 %v3349_v51, %v1420_v58  ;;  %v1424_v57 = vmul.f32 %v1417_v11, %v3345_v6  ;;  %v1425_v4 = vmul.f32 %v1415_v15, %v3346_v62  ;;  %v1411_v47 = vpop.permute.xlu0 %1410  ;;  %v3352_v20 = vld [vmem:[#allocation16_spill] sm:$0xff] }
 0x2af   : > { %v1395_v16 = vadd.f32 %v1387_v24, %v1334_v30  ;;  %v1442_v12 = vmul.f32 %v3349_v51, %v1421_v2  ;;  %v1412_v61 = vsel %vm711_vm7, %v3343_v48, %v1409_v22  ;;  %v1418_v53 = vsel %vm711_vm7, %v1409_v22, %v3344_v18 }
 0x2b0   : > { %v1449_v27 = vadd.f32 %v1441_v1, %v1388_v60  ;;  %v1445_v45 = vmul.f32 %v3350_v56, %v1424_v57  ;;  %v1446_v28 = vmul.f32 %v3350_v56, %v1425_v4  ;;  %v1422_v21 = vmul.f32 %v1412_v61, %v3351_v49 }
 0x2b1   : > { %v1450_v52 = vadd.f32 %v1442_v12, %v1389_v19  ;;  %v1423_v30 = vmul.f32 %v1418_v53, %v3352_v20  ;;  %v1413_v35 = vsel %vm711_vm7, %v3347_v3, %v1411_v47  ;;  %v1419_v13 = vsel %vm711_vm7, %v1411_v47, %v3348_v46 }
 0x2b2   : > { %v1453_v39 = vadd.f32 %v1445_v45, %v1392_v36  ;;  %v1454_v41 = vadd.f32 %v1446_v28, %v1393_v10  ;;  %v1443_v14 = vmul.f32 %v3349_v51, %v1422_v21  ;;  %v1426_v55 = vmul.f32 %v1413_v35, %v3351_v49 }
 0x2b3   : > { %v1444_v43 = vmul.f32 %v3349_v51, %v1423_v30  ;;  %v1427_v42 = vmul.f32 %v1419_v13, %v3352_v20  ;;  %v1469_v60 = vadd.f32 %v3353_v33, %v1449_v27  ;;  %v1470_v38 = vadd.f32 %v3353_v33, %v1450_v52 }
 0x2b4   : > { %v1451_v63 = vadd.f32 %v1443_v14, %v1390_v0  ;;  %v1447_v17 = vmul.f32 %v3350_v56, %v1426_v55  ;;  %v1473_v31 = vadd.f32 %v3354_v54, %v1453_v39  ;;  %v1474_v37 = vadd.f32 %v3354_v54, %v1454_v41  ;;  %v1541_v14 = vld [vmem:[%s3193_s6] sm:$0xff] }
 0x2b5   : > { %v1452_v32 = vadd.f32 %v1444_v43, %v1391_v5  ;;  %v1448_v19 = vmul.f32 %v3350_v56, %v1427_v42  ;;  %v1881_v23 = vmul.f32 -1.442695, %v1469_v60  ;;  %v1882_v34 = vmul.f32 -1.442695, %v1470_v38  ;;  %v1542_v42 = vld [vmem:[%s3193_s6 + $0x8] sm:$0xff] }
 0x2b6   : > { %v1455_v29 = vadd.f32 %v1447_v17, %v1394_v50  ;;  %v1885_v36 = vmul.f32 -1.442695, %v1473_v31  ;;  %v1886_v25 = vmul.f32 -1.442695, %v1474_v37  ;;  %v1471_v26 = vadd.f32 %v3353_v33, %v1451_v63 }
 0x2b7   : > { %v1456_v40 = vadd.f32 %v1448_v19, %v1395_v16  ;;  %1951 = vpow2.f32 %v1881_v23  ;;  %v1472_v7 = vadd.f32 %v3353_v33, %v1452_v32 }
 0x2b8   : > { %1953 = vpow2.f32 %v1882_v34  ;;  %v1883_v10 = vmul.f32 -1.442695, %v1471_v26  ;;  %v1475_v8 = vadd.f32 %v3354_v54, %v1455_v29 }
 0x2b9   : > { %1955 = vpow2.f32 %v1885_v36  ;;  %v1884_v48 = vmul.f32 -1.442695, %v1472_v7  ;;  %v1476_v9 = vadd.f32 %v3354_v54, %v1456_v40 }
 0x2ba   : > { %1957 = vpow2.f32 %v1886_v25  ;;  %v1887_v18 = vmul.f32 -1.442695, %v1475_v8 }
 0x2bb   : > { %1959 = vpow2.f32 %v1883_v10  ;;  %v1888_v59 = vmul.f32 -1.442695, %v1476_v9 }
 0x2bc   : > { %1961 = vpow2.f32 %v1884_v48 }
 0x2bd   : > { %1963 = vpow2.f32 %v1887_v18 }
 0x2be   : > { %1965 = vpow2.f32 %v1888_v59 }
 0x2c1   : > { %v1952_v0 = vpop.eup %1951 }
 0x2c2   : > { %v1954_v5 = vpop.eup %1953  ;;  %v1501_v44 = vadd.f32 1.0, %v1952_v0  ;;  %v1555_v0 = vld [vmem:[%s3194_s7] sm:$0x1] }
 0x2c3   : > { %v1956_v6 = vpop.eup %1955  ;;  %v1502_v58 = vadd.f32 1.0, %v1954_v5 }
 0x2c4   : > { %v1958_v22 = vpop.eup %1957  ;;  %1967 = vrcp.f32 %v1501_v44  ;;  %v1505_v24 = vadd.f32 1.0, %v1956_v6 }
 0x2c5   : > { %v1960_v62 = vpop.eup %1959  ;;  %1969 = vrcp.f32 %v1502_v58  ;;  %v1506_v2 = vadd.f32 1.0, %v1958_v22 }
 0x2c6   : > { %v1962_v3 = vpop.eup %1961  ;;  %1971 = vrcp.f32 %v1505_v24  ;;  %v1503_v15 = vadd.f32 1.0, %v1960_v62 }
 0x2c7   : > { %v1964_v46 = vpop.eup %1963  ;;  %1973 = vrcp.f32 %v1506_v2  ;;  %v1504_v11 = vadd.f32 1.0, %v1962_v3 }
 0x2c8   : > { %v1966_v50 = vpop.eup %1965  ;;  %1975 = vrcp.f32 %v1503_v15  ;;  %v1507_v51 = vadd.f32 1.0, %v1964_v46 }
 0x2c9   : > { %1977 = vrcp.f32 %v1504_v11  ;;  %v1508_v1 = vadd.f32 1.0, %v1966_v50 }
 0x2ca   : > { %1979 = vrcp.f32 %v1507_v51 }
 0x2cb   : > { %1981 = vrcp.f32 %v1508_v1  ;;  %v1565_v1 = vld [vmem:[%s3195_s8 + $0x8] sm:$0xff] }
 0x2ce   : > { %v1968_v57 = vpop.eup %1967 }
 0x2cf   : > { %v1970_v4 = vpop.eup %1969  ;;  %v3106_v47 = vmul.f32 %v1968_v57, %v1469_v60  ;;  %v1564_v57 = vld [vmem:[%s3195_s8] sm:$0xff] }
 0x2d0   : > { %v1972_v16 = vpop.eup %1971  ;;  %v3108_v12 = vmul.f32 %v1970_v4, %v1470_v38  ;;  %v3355_v4 = vld [vmem:[#allocation2_spill] sm:$0xff] }
 0x2d1   : > { %v1974_v61 = vpop.eup %1973  ;;  %v3110_v53 = vmul.f32 %v1972_v16, %v1473_v31 }
 0x2d2   : > { %v1976_v27 = vpop.eup %1975  ;;  %v1533_v56 = vadd.f32 %v3108_v12, %v3106_v47  ;;  %v3114_v45 = vmul.f32 %v1974_v61, %v1474_v37 }
 0x2d3   : > { %v1978_v28 = vpop.eup %1977  ;;  %v3118_v52 = vmul.f32 %v1976_v27, %v1471_v26 }
 0x2d4   : > { %v1980_v49 = vpop.eup %1979  ;;  %1534 = vadd.xlane.f32.xlu1 %v1533_v56  ;;  %v1536_v21 = vadd.f32 %v3114_v45, %v3110_v53  ;;  %v3120_v20 = vmul.f32 %v1978_v28, %v1472_v7 }
 0x2d5   : > { %v1982_v30 = vpop.eup %1981  ;;  %v3122_v35 = vmul.f32 %v1980_v49, %v1475_v8 }
 0x2d6   : > { %1537 = vadd.xlane.f32.xlu0 %v1536_v21  ;;  %v3124_v13 = vmul.f32 %v1982_v30, %v1476_v9  ;;  %v1608_v39 = vadd.f32 %v3120_v20, %v3118_v52 }
 0x2d8   : > { %v1611_v41 = vadd.f32 %v3124_v13, %v3122_v35 }
 0x2da   : > { %1609 = vadd.xlane.f32.xlu0 %v1608_v39  ;;  %1612 = vadd.xlane.f32.xlu1 %v1611_v41 }
 0x361   : > { %v1535_v55 = vpop.xlane.xlu1 %1534 }
 0x362   : > { %v1539_v43 = vmul.f32 0.00390625, %v1535_v55 }
 0x363   : > { %v1538_v33 = vpop.xlane.xlu0 %1537 }
 0x364   : > { %v1543_v60 = vmul.f32 %v1541_v14, %v1539_v43  ;;  %v1540_v38 = vmul.f32 0.00390625, %v1538_v33  ;;  %v1579_v43 = vld [vmem:[%s3196_s9 + $0x8] sm:$0xff] }
 0x366   : > { %v1544_v63 = vmul.f32 %v1542_v42, %v1540_v38  ;;  %v1546_v31 = vsel %vm1545_vm10, %v1543_v60, 0.0 }
 0x367   : > { %v1613_v17 = vpop.xlane.xlu1 %1612  ;;  %v1610_v54 = vpop.xlane.xlu0 %1609 }
 0x368   : > { %v1547_v37 = vsel %vm1545_vm10, %v1544_v63, 0.0  ;;  %v1615_v32 = vmul.f32 0.00390625, %v1613_v17  ;;  %v1614_v19 = vmul.f32 0.00390625, %v1610_v54 }
 0x369   : > { %v1548_v23 = vadd.f32 %v1547_v37, %v1546_v31 }
 0x36a   : > { %v1617_v34 = vmul.f32 %v1615_v32, %v1542_v42  ;;  %v1616_v29 = vmul.f32 %v1614_v19, %v1541_v14  ;;  %v1578_v42 = vld [vmem:[%s3196_s9] sm:$0xff] }
 0x36b   : > { %v1549_v36 = vrot.slane %v1548_v23, 4 }
 0x36c   : > { %v1619_v25 = vsel %vm1545_vm10, %v1617_v34, 0.0  ;;  %v1618_v26 = vsel %vm1545_vm10, %v1616_v29, 0.0 }
 0x36d   : > { %v1550_v40 = vadd.f32 %v1549_v36, %v1548_v23  ;;  %v1620_v7 = vadd.f32 %v1619_v25, %v1618_v26 }
 0x36f   : > { %v1551_v10 = vrot.slane %v1550_v40, 2  ;;  %v1621_v8 = vrot.slane %v1620_v7, 4 }
 0x371   : > { %v1552_v48 = vadd.f32 %v1551_v10, %v1550_v40  ;;  %v1622_v9 = vadd.f32 %v1621_v8, %v1620_v7 }
 0x373   : > { %v1553_v18 = vrot.slane %v1552_v48, 1  ;;  %v1623_v59 = vrot.slane %v1622_v9, 2 }
 0x375   : > { %v1554_v5 = vadd.f32 %v1553_v18, %v1552_v48  ;;  %v1624_v44 = vadd.f32 %v1623_v59, %v1622_v9 }
 0x377   : > { %v1625_v6 = vrot.slane %v1624_v44, 1  ;;  %v1556_v58 = vadd.f32 %v1555_v0, %v1554_v5 }
 0x379   : > { %v1626_v22 = vadd.f32 %v1625_v6, %v1624_v44  ;;  %v1889_v24 = vmul.f32 -1.442695, %v1556_v58 }
 0x37b   : > { %1983 = vpow2.f32 %v1889_v24  ;;  %v1627_v62 = vadd.f32 %v1626_v22, %v1555_v0  ;;  %v1680_v0 = vld [vmem:[%s3198_s11] sm:$0xff] }
 0x37d   : > { %v1892_v2 = vmul.f32 -1.442695, %v1627_v62 }
 0x37f   : > { %1985 = vpow2.f32 %v1892_v2 }
 0x385   : > { %v1984_v3 = vpop.eup %1983 }
 0x386   : > { %v1560_v15 = vadd.f32 1.0, %v1984_v3 }
 0x388   : > { %1987 = vrcp.f32 %v1560_v15 }
 0x389   : > { %v1986_v46 = vpop.eup %1985 }
 0x38a   : > { %v1631_v11 = vadd.f32 1.0, %v1986_v46 }
 0x38c   : > { %1989 = vrcp.f32 %v1631_v11 }
 0x392   : > { %v1988_v50 = vpop.eup %1987 }
 0x393   : > { %v1563_v51 = vmul.f32 %v1988_v50, %v1556_v58 }
 0x395   : > { %v1569_v16 = vrot.slane %v1563_v51, %v3355_v4 }
 0x396   : > { %v1990_v61 = vpop.eup %1989 }
 0x397   : > { %v1571_v27 = vmul.f32 %v1569_v16, %v1565_v1  ;;  %v1570_v56 = vmul.f32 %v1569_v16, %v1564_v57  ;;  %v1634_v28 = vmul.f32 %v1990_v61, %v1627_v62  ;;  %v2008_v61 = vld [vmem:[%s2109_s27 + $0x8] sm:$0xff] }
 0x399   : > { %v1575_v49 = vsel %vm1545_vm10, %v1571_v27, 0.0  ;;  %v1572_v21 = vsel %vm1545_vm10, %v1570_v56, 0.0  ;;  %v1638_v30 = vrot.slane %v1634_v28, %v3355_v4 }
 0x39a   : > { %1576 = vadd.xlane.f32.xlu1 %v1575_v49  ;;  %1573 = vadd.xlane.f32.xlu0 %v1572_v21 }
 0x39b   : > { %v1640_v39 = vmul.f32 %v1638_v30, %v1565_v1  ;;  %v1639_v41 = vmul.f32 %v1638_v30, %v1564_v57  ;;  %v2007_v57 = vld [vmem:[%s2109_s27] sm:$0xff] }
 0x39d   : > { %v1644_v14 = vsel %vm1545_vm10, %v1640_v39, 0.0  ;;  %v1641_v55 = vsel %vm1545_vm10, %v1639_v41, 0.0  ;;  %v2009_v39 = vld [vmem:[%s2109_s27 + $0x10] sm:$0xff] }
 0x39e   : > { %1645 = vadd.xlane.f32.xlu1 %v1644_v14  ;;  %1642 = vadd.xlane.f32.xlu0 %v1641_v55  ;;  %v2010_v55 = vld [vmem:[%s2109_s27 + $0x18] sm:$0xff] }
 0x427   : > { %v1577_v33 = vpop.xlane.xlu1 %1576  ;;  %v1574_v60 = vpop.xlane.xlu0 %1573 }
 0x428   : > { %v1581_v38 = vadd.f32 %v1579_v43, %v1577_v33  ;;  %v1580_v63 = vadd.f32 %v1578_v42, %v1574_v60 }
 0x42a   : > { %v1891_v17 = vmul.f32 -1.442695, %v1581_v38  ;;  %v1890_v54 = vmul.f32 -1.442695, %v1580_v63 }
 0x42b   : > { %v1646_v31 = vpop.xlane.xlu1 %1645  ;;  %v1643_v37 = vpop.xlane.xlu0 %1642 }
 0x42c   : > { %1991 = vpow2.f32 %v1891_v17  ;;  %v1648_v32 = vadd.f32 %v1646_v31, %v1579_v43  ;;  %v1647_v19 = vadd.f32 %v1643_v37, %v1578_v42 }
 0x42d   : > { %1993 = vpow2.f32 %v1890_v54 }
 0x42e   : > { %v1894_v23 = vmul.f32 -1.442695, %v1648_v32  ;;  %v1893_v34 = vmul.f32 -1.442695, %v1647_v19 }
 0x430   : > { %1995 = vpow2.f32 %v1894_v23 }
 0x431   : > { %1997 = vpow2.f32 %v1893_v34 }
 0x436   : > { %v1992_v29 = vpop.eup %1991 }
 0x437   : > { %v1994_v36 = vpop.eup %1993  ;;  %v1589_v25 = vadd.f32 1.0, %v1992_v29 }
 0x438   : > { %v1588_v26 = vadd.f32 1.0, %v1994_v36 }
 0x439   : > { %1999 = vrcp.f32 %v1589_v25 }
 0x43a   : > { %v1996_v40 = vpop.eup %1995  ;;  %2001 = vrcp.f32 %v1588_v26 }
 0x43b   : > { %v1998_v7 = vpop.eup %1997  ;;  %v1656_v10 = vadd.f32 1.0, %v1996_v40 }
 0x43c   : > { %v1655_v8 = vadd.f32 1.0, %v1998_v7 }
 0x43d   : > { %2003 = vrcp.f32 %v1656_v10 }
 0x43e   : > { %2005 = vrcp.f32 %v1655_v8 }
 0x443   : > { %v2000_v48 = vpop.eup %1999 }
 0x444   : > { %v2002_v9 = vpop.eup %2001  ;;  %1601 = vperm.xlu1 %1917, %v2000_v48  }
 0x445   : > { %1596 = vperm.xlu0 %1916, %v2002_v9  }
 0x447   : > { %v2004_v18 = vpop.eup %2003 }
 0x448   : > { %v2006_v59 = vpop.eup %2005 }
 0x449   : > { %1668 = vperm.xlu0 %1916, %v2004_v18   ;;  %1663 = vperm.xlu1 %1917, %v2006_v59  }
 0x44d   : > { %1683 = vperm.xlu1 %1917, %v1680_v0  }
 0x4c3   : > { %v1602_v5 = vpop.permute.xlu1 %1601 }
 0x4c4   : > { %v1606_v44 = vmul.f32 %v1602_v5, %v3110_v53  ;;  %v1607_v6 = vmul.f32 %v1602_v5, %v3114_v45  ;;  %v1597_v58 = vpop.permute.xlu0 %1596 }
 0x4c5   : > { %v1604_v22 = vmul.f32 %v1597_v58, %v3106_v47  ;;  %v1605_v24 = vmul.f32 %v1597_v58, %v3108_v12  ;;  %v1675_v47 = vld [vmem:[%s3197_s10] sm:$0xf] }
 0x4c7   : > { %v1676_v62 = vpack.c.bf16 %v1606_v44, %v1604_v22  ;;  %v1677_v2 = vpack.c.bf16 %v1607_v6, %v1605_v24 }
 0x4c8   : > { %v1664_v3 = vpop.permute.xlu1 %1663  ;;  %v1669_v15 = vpop.permute.xlu0 %1668 }
 0x4c9   : > { %v1671_v46 = vmul.f32 %v1664_v3, %v3118_v52  ;;  %v1672_v11 = vmul.f32 %v1664_v3, %v3120_v20  ;;  %v1673_v50 = vmul.f32 %v1669_v15, %v3122_v35  ;;  %v1674_v53 = vmul.f32 %v1669_v15, %v3124_v13  ;;  %1690 = vmatprep.subr.bf16.mxu0 %v1677_v2 }
 0x4ca   : > { %1691 = vmatpush1.bf16.msra.mxu0 %v1676_v62 }
 0x4cb   : > { %v1678_v12 = vpack.c.bf16 %v1673_v50, %v1671_v46  ;;  %v1679_v45 = vpack.c.bf16 %v1674_v53, %v1672_v11 }
 0x4cc   : > { %v1684_v52 = vpop.permute.xlu1 %1683 }
 0x4cd   : > { %1895 = vmatmul.mubr.msk.bf16.vlgmr.msra.gmra.mrb[4].mxu0 %vm1686_vm11, %v1675_v47  ;;  %1731 = vmatprep.subr.bf16.mxu1 %v1679_v45 }
 0x4ce   : > { %1732 = vmatpush1.bf16.msra.mxu1 %v1678_v12 }
 0x4d1   : > { %1896 = vmatmul.mubr.msk.bf16.vlgmr.msra.gmra.mrb[4].mxu1 %vm1686_vm11, %v1675_v47 }
 0x5a0   : > { %v1724_v20 = vpop.f32.mrb[4].mxu0 }
 0x5a1   : > { %v1725_v35 = vadd.f32 %v1724_v20, %v1684_v52  ;;  %v1726_v51 = vpop.f32.mrb[5].mxu0 }
 0x5a2   : > { %v1727_v13 = vadd.f32 %v1726_v51, %v1684_v52  ;;  %v1728_v1 = vpop.f32.mrb[6].mxu0 }
 0x5a3   : > { %v1772_v4 = vadd.f32 %v2007_v57, %v1725_v35  ;;  %v1729_v16 = vpop.f32.mrb[7].mxu0 }
 0x5a4   : > { %v1773_v27 = vadd.f32 %v2008_v61, %v1727_v13  ;;  %v1765_v56 = vpop.f32.mrb[4].mxu1 }
 0x5a5   : > { %1776 = vst [vmem:[%s415_s24] sm:$0xff] %v1772_v4  ;;  %v1766_v28 = vadd.f32 %v1765_v56, %v1684_v52  ;;  %v1767_v49 = vpop.f32.mrb[5].mxu1 }
 0x5a6   : > { %1777 = vst [vmem:[%s415_s24 + $0x8] sm:$0xff] %v1773_v27  ;;  %v1768_v21 = vadd.f32 %v1767_v49, %v1684_v52  ;;  %v1769_v30 = vpop.f32.mrb[6].mxu1 }
 0x5a7   : > { %v1774_v41 = vadd.f32 %v2009_v39, %v1766_v28  ;;  %v1770_v14 = vpop.f32.mrb[7].mxu1 }
 0x5a8   : > { %v1775_v43 = vadd.f32 %v2010_v55, %v1768_v21 }
 0x5a9   : > { %1778 = vst [vmem:[%s415_s24 + $0x10] sm:$0xff] %v1774_v41 }
 0x5aa   : > { %1779 = vst [vmem:[%s415_s24 + $0x18] sm:$0xff] %v1775_v43 }
 0x5ab PF: > { %s22_s21 = sadd.s32 1, %s2017_s21  }
 0x5ac   : > { %p19_p4 = scmp.ge.s32.totalorder %s22_s21, 4  }
 0x5ae   :  { %21 = sbr.rel (!%p19_p4) target bundleno = 1 (0x1), region = 113 }

</bundles_post_ra>
